<compile_context>
chip_gen: v7x
topology: tpu7x:2x2x1
jax: 0.10.0
libtpu: 0.0.40
codegen_flags: <defaults>
</compile_context>

<pallas_src>
import functools

import jax
import jax.numpy as jnp
from jax import lax
from jax.experimental import pallas as pl
from jax.experimental.pallas import tpu as pltpu

EPS = 1.1e-5                    # nn.BatchNorm2d(eps=1.1e-05)
VMEM_LIMIT = 32 * 1024 * 1024   # explicit scoped-VMEM budget (safe v5e..v7x)


def _pick_m_tile(m, target=1024):
    """Largest multiple-of-128 divisor of m that is <= target (falls back to m)."""
    best = None
    t = 128
    while t <= min(m, target):
        if m % t == 0:
            best = t
        t += 128
    return best if best is not None else m


# --------------------------- Pallas kernels ---------------------------------


def _affine_relu_conv1x1_kernel(x_ref, s_ref, b_ref, w_ref, o_ref):
    """x: (Cin, tm), s/b: (Cin, 1) folded BN1+Scale1, w: (C4, Cin), o: (C4, tm)."""
    h = jnp.maximum(x_ref[...] * s_ref[...] + b_ref[...], 0.0)       # f32 VPU
    o_ref[...] = jnp.dot(w_ref[...].astype(jnp.bfloat16),            # bf16 MXU
                         h.astype(jnp.bfloat16),
                         preferred_element_type=jnp.float32)


def _affine_relu_conv3x3_kernel(y_ref, s_ref, b_ref, w_ref, o_ref, *, H, W):
    """One image per grid step.

    y: (C4, H*W) conv2d1 output, s/b: (C4, 1) folded BN2+Scale2,
    w: (9, G, C4) tap-major 3x3 weights, o: (G, H*W).

    The 3x3/pad=1 conv is 9 accumulated matmuls over lane-rolled + masked
    copies of z = relu(y*s+b); positions whose source tap falls outside the
    image (or crosses a row) are zeroed, which is exactly the zero padding of
    the reference convolution.  No im2col buffer is ever materialized.
    """
    hw = H * W
    c4 = y_ref.shape[0]
    z = jnp.maximum(y_ref[...] * s_ref[...] + b_ref[...], 0.0)        # (C4, HW) f32
    pos = lax.broadcasted_iota(jnp.int32, (c4, hw), 1)                # flat h*W + w
    xpos = pos % W
    acc = jnp.zeros(o_ref.shape, jnp.float32)
    for dy in range(3):
        for dx in range(3):
            delta = (dy - 1) * W + (dx - 1)
            if delta == 0:
                ztap = z
            else:
                # shifted[p] = z[(p + delta) mod hw]
                shifted = pltpu.roll(z, shift=(-delta) % hw, axis=1)
                src = pos + delta
                xsrc = xpos + (dx - 1)
                valid = (xsrc >= 0) & (xsrc < W) & (src >= 0) & (src < hw)
                ztap = jnp.where(valid, shifted, 0.0)
            acc += jnp.dot(w_ref[dy * 3 + dx].astype(jnp.bfloat16),
                           ztap.astype(jnp.bfloat16),
                           preferred_element_type=jnp.float32)
    o_ref[...] = acc


# ------------------------------ wrappers -------------------------------------


def _fold_bn_scale(x_cm, bn_w, bn_b, sc_g, sc_b):
    """Fold train-mode BatchNorm (global batch stats over M, biased var) and the
    Scale layer into one per-channel (scale, bias).  x_cm is (C, M)."""
    mean = jnp.mean(x_cm, axis=1, keepdims=True)
    var = jnp.var(x_cm, axis=1, keepdims=True)
    inv = lax.rsqrt(var + EPS)
    s = (bn_w * sc_g)[:, None] * inv
    b = (bn_b[:, None] - bn_w[:, None] * mean * inv) * sc_g[:, None] + sc_b[:, None]
    return s, b


def conv_block_forward(x_cm, p, n, hh, ww):
    """One conv_block. x_cm: (Cin, M) channels-first flat -> (G, M)."""
    cin, m = x_cm.shape
    c4 = p["w1"].shape[0]
    g = p["w2"].shape[0]
    hw = hh * ww

    # ---- norm1 + scale1 folded (global stats, plain-JAX reduction) ----
    s1, b1 = _fold_bn_scale(x_cm, p["bn1_w"], p["bn1_b"], p["sc1_g"], p["sc1_b"])

    # ---- kernel A: affine + relu + 1x1 conv, M tiled & pipelined ----
    tm = _pick_m_tile(m)
    y = pl.pallas_call(
        _affine_relu_conv1x1_kernel,
        out_shape=jax.ShapeDtypeStruct((c4, m), jnp.float32),
        grid=(m // tm,),
        in_specs=[pl.BlockSpec((cin, tm), lambda i: (0, i)),
                  pl.BlockSpec((cin, 1), lambda i: (0, 0)),
                  pl.BlockSpec((cin, 1), lambda i: (0, 0)),
                  pl.BlockSpec((c4, cin), lambda i: (0, 0))],
        out_specs=pl.BlockSpec((c4, tm), lambda i: (0, i)),
        compiler_params=pltpu.CompilerParams(
            dimension_semantics=("parallel",),
            vmem_limit_bytes=VMEM_LIMIT),
    )(x_cm, s1, b1, p["w1"])

    # ---- norm2 + scale2 folded (global stats of the conv2d1 output) ----
    s2, b2 = _fold_bn_scale(y, p["bn2_w"], p["bn2_b"], p["sc2_g"], p["sc2_b"])

    # ---- kernel B: affine + relu + 3x3 conv as 9 accumulated matmuls ----
    # torch conv2d2 weight (G, C4, 3, 3) -> tap-major (9, G, C4); this explicit
    # (kh, kw, out, in) permute is required when porting real PyTorch weights.
    w2t = jnp.transpose(p["w2"], (2, 3, 0, 1)).reshape(9, g, c4)
    out = pl.pallas_call(
        functools.partial(_affine_relu_conv3x3_kernel, H=hh, W=ww),
        out_shape=jax.ShapeDtypeStruct((g, m), jnp.float32),
        grid=(n,),
        in_specs=[pl.BlockSpec((c4, hw), lambda i: (0, i)),
                  pl.BlockSpec((c4, 1), lambda i: (0, 0)),
                  pl.BlockSpec((c4, 1), lambda i: (0, 0)),
                  pl.BlockSpec((9, g, c4), lambda i: (0, 0, 0))],
        out_specs=pl.BlockSpec((g, hw), lambda i: (0, i)),
        compiler_params=pltpu.CompilerParams(
            dimension_semantics=("parallel",),
            vmem_limit_bytes=VMEM_LIMIT),
    )(y, s2, b2, w2t)
    return out


@jax.jit
def dense_block_forward(x_nchw, layer_params):
    """dense_block: repeatedly apply conv_block to the concatenated features.
    Input / output are NCHW float32 like the PyTorch module."""
    n, c0, hh, ww = x_nchw.shape
    m = n * hh * ww
    g = layer_params[0]["w2"].shape[0]
    c_total = c0 + len(layer_params) * g
    # TODO(synk): for n > 1, kernel B assumes H*W is a multiple of 128 so one
    # image is a lane-aligned block; generalize with a (N, C, H*W) layout.
    assert n == 1 or (hh * ww) % 128 == 0

    # Preallocated channels-first flat feature buffer; each layer appends its
    # G new channel rows in place (no repeated growing concatenation).
    buf = jnp.zeros((c_total, m), jnp.float32)
    buf = lax.dynamic_update_slice(
        buf, jnp.transpose(x_nchw, (1, 0, 2, 3)).reshape(c0, m), (0, 0))
    c_cur = c0
    for p in layer_params:
        feat_in = lax.slice(buf, (0, 0), (c_cur, m))
        new_feat = conv_block_forward(feat_in, p, n, hh, ww)
        buf = lax.dynamic_update_slice(buf, new_feat, (c_cur, 0))
        c_cur += g
    return jnp.transpose(buf.reshape(c_total, n, hh, ww), (1, 0, 2, 3))


# --------------------------- params & reference ------------------------------


def init_dense_block_params(key, nb_layers, nb_filter, growth_rate):
    """Synthetic parameters in PyTorch layouts:
    w1 = conv2d1.weight[:, :, 0, 0]  (4g, Cin);  w2 = conv2d2.weight (g, 4g, 3, 3)."""
    params = []
    for i in range(nb_layers):
        cin = nb_filter + i * growth_rate
        c4 = 4 * growth_rate
        key, *ks = jax.random.split(key, 11)
        params.append({
            "bn1_w": 1.0 + 0.1 * jax.random.normal(ks[0], (cin,), jnp.float32),
            "bn1_b": 0.1 * jax.random.normal(ks[1], (cin,), jnp.float32),
            "sc1_g": 1.0 + 0.1 * jax.random.normal(ks[2], (cin,), jnp.float32),
            "sc1_b": 0.1 * jax.random.normal(ks[3], (cin,), jnp.float32),
            "w1": (jax.random.normal(ks[4], (c4, cin), jnp.float32)
                   * jnp.sqrt(2.0 / cin)),
            "bn2_w": 1.0 + 0.1 * jax.random.normal(ks[5], (c4,), jnp.float32),
            "bn2_b": 0.1 * jax.random.normal(ks[6], (c4,), jnp.float32),
            "sc2_g": 1.0 + 0.1 * jax.random.normal(ks[7], (c4,), jnp.float32),
            "sc2_b": 0.1 * jax.random.normal(ks[8], (c4,), jnp.float32),
            "w2": (jax.random.normal(ks[9], (growth_rate, c4, 3, 3), jnp.float32)
                   * jnp.sqrt(2.0 / (9 * c4))),
        })
    return params


def _reference_dense_block(x_nchw, layer_params):
    """Plain-JAX/XLA reference of the PyTorch forward (train-mode BN)."""
    def bn_scale_relu(t, bw, bb, sg, sb):
        mean = t.mean(axis=(0, 2, 3), keepdims=True)
        var = t.var(axis=(0, 2, 3), keepdims=True)
        t = (t - mean) * lax.rsqrt(var + EPS)
        t = t * bw[None, :, None, None] + bb[None, :, None, None]
        t = t * sg[None, :, None, None] + sb[None, :, None, None]
        return jnp.maximum(t, 0.0)

    feats = x_nchw
    for p in layer_params:
        h = bn_scale_relu(feats, p["bn1_w"], p["bn1_b"], p["sc1_g"], p["sc1_b"])
        y = lax.conv_general_dilated(
            h, p["w1"][:, :, None, None], (1, 1), "VALID",
            dimension_numbers=("NCHW", "OIHW", "NCHW"))
        z = bn_scale_relu(y, p["bn2_w"], p["bn2_b"], p["sc2_g"], p["sc2_b"])
        out = lax.conv_general_dilated(
            z, p["w2"], (1, 1), ((1, 1), (1, 1)),
            dimension_numbers=("NCHW", "OIHW", "NCHW"))
        feats = jnp.concatenate([feats, out], axis=1)
    return feats


if __name__ == "__main__":
    key = jax.random.PRNGKey(0)
    N, C, H, W = 2, 4, 16, 16
    nb_layers, growth_rate = 3, 4

    kx, kp = jax.random.split(key)
    x = jax.random.normal(kx, (N, C, H, W), dtype=jnp.float32)
    params = init_dense_block_params(kp, nb_layers, C, growth_rate)

    out = jax.block_until_ready(dense_block_forward(x, params))

    expected_channels = C + nb_layers * growth_rate
    assert out.shape == (N, expected_channels, H, W), out.shape
    assert bool(jnp.all(jnp.isfinite(out)))

    # Numerical check against a plain-JAX reference (loose tol: bf16 MXU inputs).
    ref = jax.block_until_ready(_reference_dense_block(x, params))
    max_err = float(jnp.max(jnp.abs(out - ref)))
    assert max_err < 0.15, max_err

    print("KERNEL_OK")
</pallas_src>

<mosaic_0001>
module attributes {stable_mosaic.version = 11 : i64} {
  func.func @_affine_relu_conv1x1_kernel(%arg0: i32, %arg1: memref<4x512xf32, #tpu.memory_space<vmem>>, %arg2: memref<4x1xf32, #tpu.memory_space<vmem>>, %arg3: memref<4x1xf32, #tpu.memory_space<vmem>>, %arg4: memref<16x4xf32, #tpu.memory_space<vmem>>, %arg5: memref<16x512xf32, #tpu.memory_space<vmem>>) attributes {dimension_semantics = [#tpu.dimension_semantics<parallel>], iteration_bounds = array<i64: 1>, scalar_prefetch = 0 : i64, scratch_operands = 0 : i64, tpu.core_type = #tpu.core_type<tc>, window_params = [{transform_indices = @transform_0, window_bounds = array<i64: 4, 512>}, {pipeline_mode = #tpu.pipeline_mode<synchronous>, transform_indices = @transform_1, window_bounds = array<i64: 4, 1>}, {pipeline_mode = #tpu.pipeline_mode<synchronous>, transform_indices = @transform_2, window_bounds = array<i64: 4, 1>}, {pipeline_mode = #tpu.pipeline_mode<synchronous>, transform_indices = @transform_3, window_bounds = array<i64: 16, 4>}, {transform_indices = @transform_4, window_bounds = array<i64: 16, 512>}]} {
    %c0 = arith.constant 0 : index
    %c0_0 = arith.constant 0 : index
    %0 = vector.load %arg1[%c0, %c0_0] : memref<4x512xf32, #tpu.memory_space<vmem>>, vector<4x512xf32>
    %c0_1 = arith.constant 0 : index
    %c0_2 = arith.constant 0 : index
    %1 = vector.load %arg2[%c0_1, %c0_2] : memref<4x1xf32, #tpu.memory_space<vmem>>, vector<4x1xf32>
    %2 = vector.broadcast %1 : vector<4x1xf32> to vector<4x512xf32>
    %3 = arith.mulf %0, %2 : vector<4x512xf32>
    %c0_3 = arith.constant 0 : index
    %c0_4 = arith.constant 0 : index
    %4 = vector.load %arg3[%c0_3, %c0_4] : memref<4x1xf32, #tpu.memory_space<vmem>>, vector<4x1xf32>
    %5 = vector.broadcast %4 : vector<4x1xf32> to vector<4x512xf32>
    %6 = arith.addf %3, %5 : vector<4x512xf32>
    %cst = arith.constant 0.000000e+00 : f32
    %7 = vector.broadcast %cst : f32 to vector<4x512xf32>
    %8 = arith.maximumf %6, %7 : vector<4x512xf32>
    %c0_5 = arith.constant 0 : index
    %c0_6 = arith.constant 0 : index
    %9 = vector.load %arg4[%c0_5, %c0_6] : memref<16x4xf32, #tpu.memory_space<vmem>>, vector<16x4xf32>
    %10 = arith.truncf %9 : vector<16x4xf32> to vector<16x4xbf16>
    %11 = arith.truncf %8 : vector<4x512xf32> to vector<4x512xbf16>
    %cst_7 = arith.constant dense<0.000000e+00> : vector<16x512xf32>
    %12 = tpu.matmul %10, %11, %cst_7 {dimension_numbers = #tpu.dot_dimension_numbers<[1], [0], [0], [1], [0, 0, 1, 1], [], []>} : vector<16x4xbf16>, vector<4x512xbf16>, vector<16x512xf32> -> vector<16x512xf32>
    %c0_8 = arith.constant 0 : index
    %c0_9 = arith.constant 0 : index
    %13 = vector.load %arg5[%c0_8, %c0_9] : memref<16x512xf32, #tpu.memory_space<vmem>>, vector<16x512xf32>
    tpu.vector_store %arg5[%c0_8, %c0_9], %12 {strides = array<i32>} : memref<16x512xf32, #tpu.memory_space<vmem>>, vector<16x512xf32>,
    return
  }
  func.func @transform_0(%arg0: i32) -> (i32, i32) {
    %c0_i32 = arith.constant 0 : i32
    %c0_i32_0 = arith.constant 0 : i32
    return %c0_i32, %arg0 : i32, i32
  }
  func.func @transform_1(%arg0: i32) -> (i32, i32) {
    %c0_i32 = arith.constant 0 : i32
    %c0_i32_0 = arith.constant 0 : i32
    %c0_i32_1 = arith.constant 0 : i32
    return %c0_i32, %c0_i32_0 : i32, i32
  }
  func.func @transform_2(%arg0: i32) -> (i32, i32) {
    %c0_i32 = arith.constant 0 : i32
    %c0_i32_0 = arith.constant 0 : i32
    %c0_i32_1 = arith.constant 0 : i32
    return %c0_i32, %c0_i32_0 : i32, i32
  }
  func.func @transform_3(%arg0: i32) -> (i32, i32) {
    %c0_i32 = arith.constant 0 : i32
    %c0_i32_0 = arith.constant 0 : i32
    %c0_i32_1 = arith.constant 0 : i32
    return %c0_i32, %c0_i32_0 : i32, i32
  }
  func.func @transform_4(%arg0: i32) -> (i32, i32) {
    %c0_i32 = arith.constant 0 : i32
    %c0_i32_0 = arith.constant 0 : i32
    return %c0_i32, %arg0 : i32, i32
  }
}

module attributes {stable_mosaic.version = 11 : i64} {
  func.func @_affine_relu_conv3x3_kernel(%arg0: i32, %arg1: memref<16x256xf32, #tpu.memory_space<vmem>>, %arg2: memref<16x1xf32, #tpu.memory_space<vmem>>, %arg3: memref<16x1xf32, #tpu.memory_space<vmem>>, %arg4: memref<9x4x16xf32, #tpu.memory_space<vmem>>, %arg5: memref<4x256xf32, #tpu.memory_space<vmem>>) attributes {dimension_semantics = [#tpu.dimension_semantics<parallel>], iteration_bounds = array<i64: 2>, scalar_prefetch = 0 : i64, scratch_operands = 0 : i64, tpu.core_type = #tpu.core_type<tc>, window_params = [{transform_indices = @transform_0, window_bounds = array<i64: 16, 256>}, {pipeline_mode = #tpu.pipeline_mode<synchronous>, transform_indices = @transform_1, window_bounds = array<i64: 16, 1>}, {pipeline_mode = #tpu.pipeline_mode<synchronous>, transform_indices = @transform_2, window_bounds = array<i64: 16, 1>}, {pipeline_mode = #tpu.pipeline_mode<synchronous>, transform_indices = @transform_3, window_bounds = array<i64: 9, 4, 16>}, {transform_indices = @transform_4, window_bounds = array<i64: 4, 256>}]} {
    %c0 = arith.constant 0 : index
    %c0_0 = arith.constant 0 : index
    %0 = vector.load %arg1[%c0, %c0_0] : memref<16x256xf32, #tpu.memory_space<vmem>>, vector<16x256xf32>
    %c0_1 = arith.constant 0 : index
    %c0_2 = arith.constant 0 : index
    %1 = vector.load %arg2[%c0_1, %c0_2] : memref<16x1xf32, #tpu.memory_space<vmem>>, vector<16x1xf32>
    %2 = vector.broadcast %1 : vector<16x1xf32> to vector<16x256xf32>
    %3 = arith.mulf %0, %2 : vector<16x256xf32>
    %c0_3 = arith.constant 0 : index
    %c0_4 = arith.constant 0 : index
    %4 = vector.load %arg3[%c0_3, %c0_4] : memref<16x1xf32, #tpu.memory_space<vmem>>, vector<16x1xf32>
    %5 = vector.broadcast %4 : vector<16x1xf32> to vector<16x256xf32>
    %6 = arith.addf %3, %5 : vector<16x256xf32>
    %cst = arith.constant 0.000000e+00 : f32
    %7 = vector.broadcast %cst : f32 to vector<16x256xf32>
    %8 = arith.maximumf %6, %7 : vector<16x256xf32>
    %9 = tpu.iota {dimensions = array<i32: 1>} : vector<16x256xi32>
    %c16_i32 = arith.constant 16 : i32
    %c0_i32 = arith.constant 0 : i32
    %10 = arith.cmpi eq, %c16_i32, %c0_i32 : i32
    %c1_i32 = arith.constant 1 : i32
    %11 = arith.select %10, %c1_i32, %c16_i32 : i32
    %12 = vector.broadcast %11 : i32 to vector<16x256xi32>
    %13 = arith.remsi %9, %12 : vector<16x256xi32>
    %c0_i32_5 = arith.constant 0 : i32
    %14 = vector.broadcast %c0_i32_5 : i32 to vector<16x256xi32>
    %15 = arith.cmpi ne, %13, %14 : vector<16x256xi32>
    %c0_i32_6 = arith.constant 0 : i32
    %16 = vector.broadcast %c0_i32_6 : i32 to vector<16x256xi32>
    %17 = arith.cmpi slt, %13, %16 : vector<16x256xi32>
    %c0_i32_7 = arith.constant 0 : i32
    %18 = arith.cmpi slt, %11, %c0_i32_7 : i32
    %19 = vector.broadcast %18 : i1 to vector<16x256xi1>
    %20 = vector.broadcast %19 : vector<16x256xi1> to vector<16x256xi1>
    %21 = arith.xori %17, %20 : vector<16x256xi1>
    %22 = arith.andi %21, %15 : vector<16x256xi1>
    %23 = vector.broadcast %11 : i32 to vector<16x256xi32>
    %24 = arith.addi %13, %23 : vector<16x256xi32>
    %25 = arith.select %22, %24, %13 : vector<16x256xi1>, vector<16x256xi32>
    %cst_8 = arith.constant 0.000000e+00 : f32
    %26 = vector.broadcast %cst_8 : f32 to vector<4x256xf32>
    %c17_i32 = arith.constant 17 : i32
    %27 = tpu.dynamic_rotate %8 by %c17_i32 dim 1 : vector<16x256xf32>, i32 -> vector<16x256xf32>
    %c-17_i32 = arith.constant -17 : i32
    %28 = vector.broadcast %c-17_i32 : i32 to vector<16x256xi32>
    %29 = arith.addi %9, %28 : vector<16x256xi32>
    %c-1_i32 = arith.constant -1 : i32
    %30 = vector.broadcast %c-1_i32 : i32 to vector<16x256xi32>
    %31 = arith.addi %25, %30 : vector<16x256xi32>
    %c0_i32_9 = arith.constant 0 : i32
    %32 = vector.broadcast %c0_i32_9 : i32 to vector<16x256xi32>
    %33 = arith.cmpi sge, %31, %32 : vector<16x256xi32>
    %c16_i32_10 = arith.constant 16 : i32
    %34 = vector.broadcast %c16_i32_10 : i32 to vector<16x256xi32>
    %35 = arith.cmpi slt, %31, %34 : vector<16x256xi32>
    %36 = arith.andi %33, %35 : vector<16x256xi1>
    %c0_i32_11 = arith.constant 0 : i32
    %37 = vector.broadcast %c0_i32_11 : i32 to vector<16x256xi32>
    %38 = arith.cmpi sge, %29, %37 : vector<16x256xi32>
    %39 = arith.andi %36, %38 : vector<16x256xi1>
    %c256_i32 = arith.constant 256 : i32
    %40 = vector.broadcast %c256_i32 : i32 to vector<16x256xi32>
    %41 = arith.cmpi slt, %29, %40 : vector<16x256xi32>
    %42 = arith.andi %39, %41 : vector<16x256xi1>
    %cst_12 = arith.constant 0.000000e+00 : f32
    %43 = vector.broadcast %cst_12 : f32 to vector<16x256xf32>
    %44 = arith.select %42, %27, %43 : vector<16x256xi1>, vector<16x256xf32>
    %c0_13 = arith.constant 0 : index
    %c0_14 = arith.constant 0 : index
    %c0_15 = arith.constant 0 : index
    %45 = vector.load %arg4[%c0_13, %c0_14, %c0_15] : memref<9x4x16xf32, #tpu.memory_space<vmem>>, vector<1x4x16xf32>
    %46 = vector.shape_cast %45 : vector<1x4x16xf32> to vector<4x16xf32>
    %47 = arith.truncf %46 : vector<4x16xf32> to vector<4x16xbf16>
    %48 = arith.truncf %44 : vector<16x256xf32> to vector<16x256xbf16>
    %cst_16 = arith.constant dense<0.000000e+00> : vector<4x256xf32>
    %49 = tpu.matmul %47, %48, %cst_16 {dimension_numbers = #tpu.dot_dimension_numbers<[1], [0], [0], [1], [0, 0, 1, 1], [], []>} : vector<4x16xbf16>, vector<16x256xbf16>, vector<4x256xf32> -> vector<4x256xf32>
    %50 = arith.addf %26, %49 : vector<4x256xf32>
    %c16_i32_17 = arith.constant 16 : i32
    %51 = tpu.dynamic_rotate %8 by %c16_i32_17 dim 1 : vector<16x256xf32>, i32 -> vector<16x256xf32>
    %c-16_i32 = arith.constant -16 : i32
    %52 = vector.broadcast %c-16_i32 : i32 to vector<16x256xi32>
    %53 = arith.addi %9, %52 : vector<16x256xi32>
    %c0_i32_18 = arith.constant 0 : i32
    %54 = vector.broadcast %c0_i32_18 : i32 to vector<16x256xi32>
    %55 = arith.addi %25, %54 : vector<16x256xi32>
    %c0_i32_19 = arith.constant 0 : i32
    %56 = vector.broadcast %c0_i32_19 : i32 to vector<16x256xi32>
    %57 = arith.cmpi sge, %55, %56 : vector<16x256xi32>
    %c16_i32_20 = arith.constant 16 : i32
    %58 = vector.broadcast %c16_i32_20 : i32 to vector<16x256xi32>
    %59 = arith.cmpi slt, %55, %58 : vector<16x256xi32>
    %60 = arith.andi %57, %59 : vector<16x256xi1>
    %c0_i32_21 = arith.constant 0 : i32
    %61 = vector.broadcast %c0_i32_21 : i32 to vector<16x256xi32>
    %62 = arith.cmpi sge, %53, %61 : vector<16x256xi32>
    %63 = arith.andi %60, %62 : vector<16x256xi1>
    %c256_i32_22 = arith.constant 256 : i32
    %64 = vector.broadcast %c256_i32_22 : i32 to vector<16x256xi32>
    %65 = arith.cmpi slt, %53, %64 : vector<16x256xi32>
    %66 = arith.andi %63, %65 : vector<16x256xi1>
    %cst_23 = arith.constant 0.000000e+00 : f32
    %67 = vector.broadcast %cst_23 : f32 to vector<16x256xf32>
    %68 = arith.select %66, %51, %67 : vector<16x256xi1>, vector<16x256xf32>
    %c1 = arith.constant 1 : index
    %c0_24 = arith.constant 0 : index
    %c0_25 = arith.constant 0 : index
    %69 = vector.load %arg4[%c1, %c0_24, %c0_25] : memref<9x4x16xf32, #tpu.memory_space<vmem>>, vector<1x4x16xf32>
    %70 = vector.shape_cast %69 : vector<1x4x16xf32> to vector<4x16xf32>
    %71 = arith.truncf %70 : vector<4x16xf32> to vector<4x16xbf16>
    %72 = arith.truncf %68 : vector<16x256xf32> to vector<16x256xbf16>
    %cst_26 = arith.constant dense<0.000000e+00> : vector<4x256xf32>
    %73 = tpu.matmul %71, %72, %cst_26 {dimension_numbers = #tpu.dot_dimension_numbers<[1], [0], [0], [1], [0, 0, 1, 1], [], []>} : vector<4x16xbf16>, vector<16x256xbf16>, vector<4x256xf32> -> vector<4x256xf32>
    %74 = arith.addf %50, %73 : vector<4x256xf32>
    %c15_i32 = arith.constant 15 : i32
    %75 = tpu.dynamic_rotate %8 by %c15_i32 dim 1 : vector<16x256xf32>, i32 -> vector<16x256xf32>
    %c-15_i32 = arith.constant -15 : i32
    %76 = vector.broadcast %c-15_i32 : i32 to vector<16x256xi32>
    %77 = arith.addi %9, %76 : vector<16x256xi32>
    %c1_i32_27 = arith.constant 1 : i32
    %78 = vector.broadcast %c1_i32_27 : i32 to vector<16x256xi32>
    %79 = arith.addi %25, %78 : vector<16x256xi32>
    %c0_i32_28 = arith.constant 0 : i32
    %80 = vector.broadcast %c0_i32_28 : i32 to vector<16x256xi32>
    %81 = arith.cmpi sge, %79, %80 : vector<16x256xi32>
    %c16_i32_29 = arith.constant 16 : i32
    %82 = vector.broadcast %c16_i32_29 : i32 to vector<16x256xi32>
    %83 = arith.cmpi slt, %79, %82 : vector<16x256xi32>
    %84 = arith.andi %81, %83 : vector<16x256xi1>
    %c0_i32_30 = arith.constant 0 : i32
    %85 = vector.broadcast %c0_i32_30 : i32 to vector<16x256xi32>
    %86 = arith.cmpi sge, %77, %85 : vector<16x256xi32>
    %87 = arith.andi %84, %86 : vector<16x256xi1>
    %c256_i32_31 = arith.constant 256 : i32
    %88 = vector.broadcast %c256_i32_31 : i32 to vector<16x256xi32>
    %89 = arith.cmpi slt, %77, %88 : vector<16x256xi32>
    %90 = arith.andi %87, %89 : vector<16x256xi1>
    %cst_32 = arith.constant 0.000000e+00 : f32
    %91 = vector.broadcast %cst_32 : f32 to vector<16x256xf32>
    %92 = arith.select %90, %75, %91 : vector<16x256xi1>, vector<16x256xf32>
    %c2 = arith.constant 2 : index
    %c0_33 = arith.constant 0 : index
    %c0_34 = arith.constant 0 : index
    %93 = vector.load %arg4[%c2, %c0_33, %c0_34] : memref<9x4x16xf32, #tpu.memory_space<vmem>>, vector<1x4x16xf32>
    %94 = vector.shape_cast %93 : vector<1x4x16xf32> to vector<4x16xf32>
    %95 = arith.truncf %94 : vector<4x16xf32> to vector<4x16xbf16>
    %96 = arith.truncf %92 : vector<16x256xf32> to vector<16x256xbf16>
    %cst_35 = arith.constant dense<0.000000e+00> : vector<4x256xf32>
    %97 = tpu.matmul %95, %96, %cst_35 {dimension_numbers = #tpu.dot_dimension_numbers<[1], [0], [0], [1], [0, 0, 1, 1], [], []>} : vector<4x16xbf16>, vector<16x256xbf16>, vector<4x256xf32> -> vector<4x256xf32>
    %98 = arith.addf %74, %97 : vector<4x256xf32>
    %c1_i32_36 = arith.constant 1 : i32
    %99 = tpu.dynamic_rotate %8 by %c1_i32_36 dim 1 : vector<16x256xf32>, i32 -> vector<16x256xf32>
    %c-1_i32_37 = arith.constant -1 : i32
    %100 = vector.broadcast %c-1_i32_37 : i32 to vector<16x256xi32>
    %101 = arith.addi %9, %100 : vector<16x256xi32>
    %c-1_i32_38 = arith.constant -1 : i32
    %102 = vector.broadcast %c-1_i32_38 : i32 to vector<16x256xi32>
    %103 = arith.addi %25, %102 : vector<16x256xi32>
    %c0_i32_39 = arith.constant 0 : i32
    %104 = vector.broadcast %c0_i32_39 : i32 to vector<16x256xi32>
    %105 = arith.cmpi sge, %103, %104 : vector<16x256xi32>
    %c16_i32_40 = arith.constant 16 : i32
    %106 = vector.broadcast %c16_i32_40 : i32 to vector<16x256xi32>
    %107 = arith.cmpi slt, %103, %106 : vector<16x256xi32>
    %108 = arith.andi %105, %107 : vector<16x256xi1>
    %c0_i32_41 = arith.constant 0 : i32
    %109 = vector.broadcast %c0_i32_41 : i32 to vector<16x256xi32>
    %110 = arith.cmpi sge, %101, %109 : vector<16x256xi32>
    %111 = arith.andi %108, %110 : vector<16x256xi1>
    %c256_i32_42 = arith.constant 256 : i32
    %112 = vector.broadcast %c256_i32_42 : i32 to vector<16x256xi32>
    %113 = arith.cmpi slt, %101, %112 : vector<16x256xi32>
    %114 = arith.andi %111, %113 : vector<16x256xi1>
    %cst_43 = arith.constant 0.000000e+00 : f32
    %115 = vector.broadcast %cst_43 : f32 to vector<16x256xf32>
    %116 = arith.select %114, %99, %115 : vector<16x256xi1>, vector<16x256xf32>
    %c3 = arith.constant 3 : index
    %c0_44 = arith.constant 0 : index
    %c0_45 = arith.constant 0 : index
    %117 = vector.load %arg4[%c3, %c0_44, %c0_45] : memref<9x4x16xf32, #tpu.memory_space<vmem>>, vector<1x4x16xf32>
    %118 = vector.shape_cast %117 : vector<1x4x16xf32> to vector<4x16xf32>
    %119 = arith.truncf %118 : vector<4x16xf32> to vector<4x16xbf16>
    %120 = arith.truncf %116 : vector<16x256xf32> to vector<16x256xbf16>
    %cst_46 = arith.constant dense<0.000000e+00> : vector<4x256xf32>
    %121 = tpu.matmul %119, %120, %cst_46 {dimension_numbers = #tpu.dot_dimension_numbers<[1], [0], [0], [1], [0, 0, 1, 1], [], []>} : vector<4x16xbf16>, vector<16x256xbf16>, vector<4x256xf32> -> vector<4x256xf32>
    %122 = arith.addf %98, %121 : vector<4x256xf32>
    %c4 = arith.constant 4 : index
    %c0_47 = arith.constant 0 : index
    %c0_48 = arith.constant 0 : index
    %123 = vector.load %arg4[%c4, %c0_47, %c0_48] : memref<9x4x16xf32, #tpu.memory_space<vmem>>, vector<1x4x16xf32>
    %124 = vector.shape_cast %123 : vector<1x4x16xf32> to vector<4x16xf32>
    %125 = arith.truncf %124 : vector<4x16xf32> to vector<4x16xbf16>
    %126 = arith.truncf %8 : vector<16x256xf32> to vector<16x256xbf16>
    %cst_49 = arith.constant dense<0.000000e+00> : vector<4x256xf32>
    %127 = tpu.matmul %125, %126, %cst_49 {dimension_numbers = #tpu.dot_dimension_numbers<[1], [0], [0], [1], [0, 0, 1, 1], [], []>} : vector<4x16xbf16>, vector<16x256xbf16>, vector<4x256xf32> -> vector<4x256xf32>
    %128 = arith.addf %122, %127 : vector<4x256xf32>
    %c255_i32 = arith.constant 255 : i32
    %129 = tpu.dynamic_rotate %8 by %c255_i32 dim 1 : vector<16x256xf32>, i32 -> vector<16x256xf32>
    %c1_i32_50 = arith.constant 1 : i32
    %130 = vector.broadcast %c1_i32_50 : i32 to vector<16x256xi32>
    %131 = arith.addi %9, %130 : vector<16x256xi32>
    %c1_i32_51 = arith.constant 1 : i32
    %132 = vector.broadcast %c1_i32_51 : i32 to vector<16x256xi32>
    %133 = arith.addi %25, %132 : vector<16x256xi32>
    %c0_i32_52 = arith.constant 0 : i32
    %134 = vector.broadcast %c0_i32_52 : i32 to vector<16x256xi32>
    %135 = arith.cmpi sge, %133, %134 : vector<16x256xi32>
    %c16_i32_53 = arith.constant 16 : i32
    %136 = vector.broadcast %c16_i32_53 : i32 to vector<16x256xi32>
    %137 = arith.cmpi slt, %133, %136 : vector<16x256xi32>
    %138 = arith.andi %135, %137 : vector<16x256xi1>
    %c0_i32_54 = arith.constant 0 : i32
    %139 = vector.broadcast %c0_i32_54 : i32 to vector<16x256xi32>
    %140 = arith.cmpi sge, %131, %139 : vector<16x256xi32>
    %141 = arith.andi %138, %140 : vector<16x256xi1>
    %c256_i32_55 = arith.constant 256 : i32
    %142 = vector.broadcast %c256_i32_55 : i32 to vector<16x256xi32>
    %143 = arith.cmpi slt, %131, %142 : vector<16x256xi32>
    %144 = arith.andi %141, %143 : vector<16x256xi1>
    %cst_56 = arith.constant 0.000000e+00 : f32
    %145 = vector.broadcast %cst_56 : f32 to vector<16x256xf32>
    %146 = arith.select %144, %129, %145 : vector<16x256xi1>, vector<16x256xf32>
    %c5 = arith.constant 5 : index
    %c0_57 = arith.constant 0 : index
    %c0_58 = arith.constant 0 : index
    %147 = vector.load %arg4[%c5, %c0_57, %c0_58] : memref<9x4x16xf32, #tpu.memory_space<vmem>>, vector<1x4x16xf32>
    %148 = vector.shape_cast %147 : vector<1x4x16xf32> to vector<4x16xf32>
    %149 = arith.truncf %148 : vector<4x16xf32> to vector<4x16xbf16>
    %150 = arith.truncf %146 : vector<16x256xf32> to vector<16x256xbf16>
    %cst_59 = arith.constant dense<0.000000e+00> : vector<4x256xf32>
    %151 = tpu.matmul %149, %150, %cst_59 {dimension_numbers = #tpu.dot_dimension_numbers<[1], [0], [0], [1], [0, 0, 1, 1], [], []>} : vector<4x16xbf16>, vector<16x256xbf16>, vector<4x256xf32> -> vector<4x256xf32>
    %152 = arith.addf %128, %151 : vector<4x256xf32>
    %c241_i32 = arith.constant 241 : i32
    %153 = tpu.dynamic_rotate %8 by %c241_i32 dim 1 : vector<16x256xf32>, i32 -> vector<16x256xf32>
    %c15_i32_60 = arith.constant 15 : i32
    %154 = vector.broadcast %c15_i32_60 : i32 to vector<16x256xi32>
    %155 = arith.addi %9, %154 : vector<16x256xi32>
    %c-1_i32_61 = arith.constant -1 : i32
    %156 = vector.broadcast %c-1_i32_61 : i32 to vector<16x256xi32>
    %157 = arith.addi %25, %156 : vector<16x256xi32>
    %c0_i32_62 = arith.constant 0 : i32
    %158 = vector.broadcast %c0_i32_62 : i32 to vector<16x256xi32>
    %159 = arith.cmpi sge, %157, %158 : vector<16x256xi32>
    %c16_i32_63 = arith.constant 16 : i32
    %160 = vector.broadcast %c16_i32_63 : i32 to vector<16x256xi32>
    %161 = arith.cmpi slt, %157, %160 : vector<16x256xi32>
    %162 = arith.andi %159, %161 : vector<16x256xi1>
    %c0_i32_64 = arith.constant 0 : i32
    %163 = vector.broadcast %c0_i32_64 : i32 to vector<16x256xi32>
    %164 = arith.cmpi sge, %155, %163 : vector<16x256xi32>
    %165 = arith.andi %162, %164 : vector<16x256xi1>
    %c256_i32_65 = arith.constant 256 : i32
    %166 = vector.broadcast %c256_i32_65 : i32 to vector<16x256xi32>
    %167 = arith.cmpi slt, %155, %166 : vector<16x256xi32>
    %168 = arith.andi %165, %167 : vector<16x256xi1>
    %cst_66 = arith.constant 0.000000e+00 : f32
    %169 = vector.broadcast %cst_66 : f32 to vector<16x256xf32>
    %170 = arith.select %168, %153, %169 : vector<16x256xi1>, vector<16x256xf32>
    %c6 = arith.constant 6 : index
    %c0_67 = arith.constant 0 : index
    %c0_68 = arith.constant 0 : index
    %171 = vector.load %arg4[%c6, %c0_67, %c0_68] : memref<9x4x16xf32, #tpu.memory_space<vmem>>, vector<1x4x16xf32>
    %172 = vector.shape_cast %171 : vector<1x4x16xf32> to vector<4x16xf32>
    %173 = arith.truncf %172 : vector<4x16xf32> to vector<4x16xbf16>
    %174 = arith.truncf %170 : vector<16x256xf32> to vector<16x256xbf16>
    %cst_69 = arith.constant dense<0.000000e+00> : vector<4x256xf32>
    %175 = tpu.matmul %173, %174, %cst_69 {dimension_numbers = #tpu.dot_dimension_numbers<[1], [0], [0], [1], [0, 0, 1, 1], [], []>} : vector<4x16xbf16>, vector<16x256xbf16>, vector<4x256xf32> -> vector<4x256xf32>
    %176 = arith.addf %152, %175 : vector<4x256xf32>
    %c240_i32 = arith.constant 240 : i32
    %177 = tpu.dynamic_rotate %8 by %c240_i32 dim 1 : vector<16x256xf32>, i32 -> vector<16x256xf32>
    %c16_i32_70 = arith.constant 16 : i32
    %178 = vector.broadcast %c16_i32_70 : i32 to vector<16x256xi32>
    %179 = arith.addi %9, %178 : vector<16x256xi32>
    %c0_i32_71 = arith.constant 0 : i32
    %180 = vector.broadcast %c0_i32_71 : i32 to vector<16x256xi32>
    %181 = arith.addi %25, %180 : vector<16x256xi32>
    %c0_i32_72 = arith.constant 0 : i32
    %182 = vector.broadcast %c0_i32_72 : i32 to vector<16x256xi32>
    %183 = arith.cmpi sge, %181, %182 : vector<16x256xi32>
    %c16_i32_73 = arith.constant 16 : i32
    %184 = vector.broadcast %c16_i32_73 : i32 to vector<16x256xi32>
    %185 = arith.cmpi slt, %181, %184 : vector<16x256xi32>
    %186 = arith.andi %183, %185 : vector<16x256xi1>
    %c0_i32_74 = arith.constant 0 : i32
    %187 = vector.broadcast %c0_i32_74 : i32 to vector<16x256xi32>
    %188 = arith.cmpi sge, %179, %187 : vector<16x256xi32>
    %189 = arith.andi %186, %188 : vector<16x256xi1>
    %c256_i32_75 = arith.constant 256 : i32
    %190 = vector.broadcast %c256_i32_75 : i32 to vector<16x256xi32>
    %191 = arith.cmpi slt, %179, %190 : vector<16x256xi32>
    %192 = arith.andi %189, %191 : vector<16x256xi1>
    %cst_76 = arith.constant 0.000000e+00 : f32
    %193 = vector.broadcast %cst_76 : f32 to vector<16x256xf32>
    %194 = arith.select %192, %177, %193 : vector<16x256xi1>, vector<16x256xf32>
    %c7 = arith.constant 7 : index
    %c0_77 = arith.constant 0 : index
    %c0_78 = arith.constant 0 : index
    %195 = vector.load %arg4[%c7, %c0_77, %c0_78] : memref<9x4x16xf32, #tpu.memory_space<vmem>>, vector<1x4x16xf32>
    %196 = vector.shape_cast %195 : vector<1x4x16xf32> to vector<4x16xf32>
    %197 = arith.truncf %196 : vector<4x16xf32> to vector<4x16xbf16>
    %198 = arith.truncf %194 : vector<16x256xf32> to vector<16x256xbf16>
    %cst_79 = arith.constant dense<0.000000e+00> : vector<4x256xf32>
    %199 = tpu.matmul %197, %198, %cst_79 {dimension_numbers = #tpu.dot_dimension_numbers<[1], [0], [0], [1], [0, 0, 1, 1], [], []>} : vector<4x16xbf16>, vector<16x256xbf16>, vector<4x256xf32> -> vector<4x256xf32>
    %200 = arith.addf %176, %199 : vector<4x256xf32>
    %c239_i32 = arith.constant 239 : i32
    %201 = tpu.dynamic_rotate %8 by %c239_i32 dim 1 : vector<16x256xf32>, i32 -> vector<16x256xf32>
    %c17_i32_80 = arith.constant 17 : i32
    %202 = vector.broadcast %c17_i32_80 : i32 to vector<16x256xi32>
    %203 = arith.addi %9, %202 : vector<16x256xi32>
    %c1_i32_81 = arith.constant 1 : i32
    %204 = vector.broadcast %c1_i32_81 : i32 to vector<16x256xi32>
    %205 = arith.addi %25, %204 : vector<16x256xi32>
    %c0_i32_82 = arith.constant 0 : i32
    %206 = vector.broadcast %c0_i32_82 : i32 to vector<16x256xi32>
    %207 = arith.cmpi sge, %205, %206 : vector<16x256xi32>
    %c16_i32_83 = arith.constant 16 : i32
    %208 = vector.broadcast %c16_i32_83 : i32 to vector<16x256xi32>
    %209 = arith.cmpi slt, %205, %208 : vector<16x256xi32>
    %210 = arith.andi %207, %209 : vector<16x256xi1>
    %c0_i32_84 = arith.constant 0 : i32
    %211 = vector.broadcast %c0_i32_84 : i32 to vector<16x256xi32>
    %212 = arith.cmpi sge, %203, %211 : vector<16x256xi32>
    %213 = arith.andi %210, %212 : vector<16x256xi1>
    %c256_i32_85 = arith.constant 256 : i32
    %214 = vector.broadcast %c256_i32_85 : i32 to vector<16x256xi32>
    %215 = arith.cmpi slt, %203, %214 : vector<16x256xi32>
    %216 = arith.andi %213, %215 : vector<16x256xi1>
    %cst_86 = arith.constant 0.000000e+00 : f32
    %217 = vector.broadcast %cst_86 : f32 to vector<16x256xf32>
    %218 = arith.select %216, %201, %217 : vector<16x256xi1>, vector<16x256xf32>
    %c8 = arith.constant 8 : index
    %c0_87 = arith.constant 0 : index
    %c0_88 = arith.constant 0 : index
    %219 = vector.load %arg4[%c8, %c0_87, %c0_88] : memref<9x4x16xf32, #tpu.memory_space<vmem>>, vector<1x4x16xf32>
    %220 = vector.shape_cast %219 : vector<1x4x16xf32> to vector<4x16xf32>
    %221 = arith.truncf %220 : vector<4x16xf32> to vector<4x16xbf16>
    %222 = arith.truncf %218 : vector<16x256xf32> to vector<16x256xbf16>
    %cst_89 = arith.constant dense<0.000000e+00> : vector<4x256xf32>
    %223 = tpu.matmul %221, %222, %cst_89 {dimension_numbers = #tpu.dot_dimension_numbers<[1], [0], [0], [1], [0, 0, 1, 1], [], []>} : vector<4x16xbf16>, vector<16x256xbf16>, vector<4x256xf32> -> vector<4x256xf32>
    %224 = arith.addf %200, %223 : vector<4x256xf32>
    %c0_90 = arith.constant 0 : index
    %c0_91 = arith.constant 0 : index
    %225 = vector.load %arg5[%c0_90, %c0_91] : memref<4x256xf32, #tpu.memory_space<vmem>>, vector<4x256xf32>
    tpu.vector_store %arg5[%c0_90, %c0_91], %224 {strides = array<i32>} : memref<4x256xf32, #tpu.memory_space<vmem>>, vector<4x256xf32>,
    return
  }
  func.func @transform_0(%arg0: i32) -> (i32, i32) {
    %c0_i32 = arith.constant 0 : i32
    %c0_i32_0 = arith.constant 0 : i32
    return %c0_i32, %arg0 : i32, i32
  }
  func.func @transform_1(%arg0: i32) -> (i32, i32) {
    %c0_i32 = arith.constant 0 : i32
    %c0_i32_0 = arith.constant 0 : i32
    %c0_i32_1 = arith.constant 0 : i32
    return %c0_i32, %c0_i32_0 : i32, i32
  }
  func.func @transform_2(%arg0: i32) -> (i32, i32) {
    %c0_i32 = arith.constant 0 : i32
    %c0_i32_0 = arith.constant 0 : i32
    %c0_i32_1 = arith.constant 0 : i32
    return %c0_i32, %c0_i32_0 : i32, i32
  }
  func.func @transform_3(%arg0: i32) -> (i32, i32, i32) {
    %c0_i32 = arith.constant 0 : i32
    %c0_i32_0 = arith.constant 0 : i32
    %c0_i32_1 = arith.constant 0 : i32
    %c0_i32_2 = arith.constant 0 : i32
    return %c0_i32, %c0_i32_0, %c0_i32_1 : i32, i32, i32
  }
  func.func @transform_4(%arg0: i32) -> (i32, i32) {
    %c0_i32 = arith.constant 0 : i32
    %c0_i32_0 = arith.constant 0 : i32
    return %c0_i32, %arg0 : i32, i32
  }
}

module attributes {stable_mosaic.version = 11 : i64} {
  func.func @_affine_relu_conv1x1_kernel(%arg0: i32, %arg1: memref<8x512xf32, #tpu.memory_space<vmem>>, %arg2: memref<8x1xf32, #tpu.memory_space<vmem>>, %arg3: memref<8x1xf32, #tpu.memory_space<vmem>>, %arg4: memref<16x8xf32, #tpu.memory_space<vmem>>, %arg5: memref<16x512xf32, #tpu.memory_space<vmem>>) attributes {dimension_semantics = [#tpu.dimension_semantics<parallel>], iteration_bounds = array<i64: 1>, scalar_prefetch = 0 : i64, scratch_operands = 0 : i64, tpu.core_type = #tpu.core_type<tc>, window_params = [{transform_indices = @transform_0, window_bounds = array<i64: 8, 512>}, {pipeline_mode = #tpu.pipeline_mode<synchronous>, transform_indices = @transform_1, window_bounds = array<i64: 8, 1>}, {pipeline_mode = #tpu.pipeline_mode<synchronous>, transform_indices = @transform_2, window_bounds = array<i64: 8, 1>}, {pipeline_mode = #tpu.pipeline_mode<synchronous>, transform_indices = @transform_3, window_bounds = array<i64: 16, 8>}, {transform_indices = @transform_4, window_bounds = array<i64: 16, 512>}]} {
    %c0 = arith.constant 0 : index
    %c0_0 = arith.constant 0 : index
    %0 = vector.load %arg1[%c0, %c0_0] : memref<8x512xf32, #tpu.memory_space<vmem>>, vector<8x512xf32>
    %c0_1 = arith.constant 0 : index
    %c0_2 = arith.constant 0 : index
    %1 = vector.load %arg2[%c0_1, %c0_2] : memref<8x1xf32, #tpu.memory_space<vmem>>, vector<8x1xf32>
    %2 = vector.broadcast %1 : vector<8x1xf32> to vector<8x512xf32>
    %3 = arith.mulf %0, %2 : vector<8x512xf32>
    %c0_3 = arith.constant 0 : index
    %c0_4 = arith.constant 0 : index
    %4 = vector.load %arg3[%c0_3, %c0_4] : memref<8x1xf32, #tpu.memory_space<vmem>>, vector<8x1xf32>
    %5 = vector.broadcast %4 : vector<8x1xf32> to vector<8x512xf32>
    %6 = arith.addf %3, %5 : vector<8x512xf32>
    %cst = arith.constant 0.000000e+00 : f32
    %7 = vector.broadcast %cst : f32 to vector<8x512xf32>
    %8 = arith.maximumf %6, %7 : vector<8x512xf32>
    %c0_5 = arith.constant 0 : index
    %c0_6 = arith.constant 0 : index
    %9 = vector.load %arg4[%c0_5, %c0_6] : memref<16x8xf32, #tpu.memory_space<vmem>>, vector<16x8xf32>
    %10 = arith.truncf %9 : vector<16x8xf32> to vector<16x8xbf16>
    %11 = arith.truncf %8 : vector<8x512xf32> to vector<8x512xbf16>
    %cst_7 = arith.constant dense<0.000000e+00> : vector<16x512xf32>
    %12 = tpu.matmul %10, %11, %cst_7 {dimension_numbers = #tpu.dot_dimension_numbers<[1], [0], [0], [1], [0, 0, 1, 1], [], []>} : vector<16x8xbf16>, vector<8x512xbf16>, vector<16x512xf32> -> vector<16x512xf32>
    %c0_8 = arith.constant 0 : index
    %c0_9 = arith.constant 0 : index
    %13 = vector.load %arg5[%c0_8, %c0_9] : memref<16x512xf32, #tpu.memory_space<vmem>>, vector<16x512xf32>
    tpu.vector_store %arg5[%c0_8, %c0_9], %12 {strides = array<i32>} : memref<16x512xf32, #tpu.memory_space<vmem>>, vector<16x512xf32>,
    return
  }
  func.func @transform_0(%arg0: i32) -> (i32, i32) {
    %c0_i32 = arith.constant 0 : i32
    %c0_i32_0 = arith.constant 0 : i32
    return %c0_i32, %arg0 : i32, i32
  }
  func.func @transform_1(%arg0: i32) -> (i32, i32) {
    %c0_i32 = arith.constant 0 : i32
    %c0_i32_0 = arith.constant 0 : i32
    %c0_i32_1 = arith.constant 0 : i32
    return %c0_i32, %c0_i32_0 : i32, i32
  }
  func.func @transform_2(%arg0: i32) -> (i32, i32) {
    %c0_i32 = arith.constant 0 : i32
    %c0_i32_0 = arith.constant 0 : i32
    %c0_i32_1 = arith.constant 0 : i32
    return %c0_i32, %c0_i32_0 : i32, i32
  }
  func.func @transform_3(%arg0: i32) -> (i32, i32) {
    %c0_i32 = arith.constant 0 : i32
    %c0_i32_0 = arith.constant 0 : i32
    %c0_i32_1 = arith.constant 0 : i32
    return %c0_i32, %c0_i32_0 : i32, i32
  }
  func.func @transform_4(%arg0: i32) -> (i32, i32) {
    %c0_i32 = arith.constant 0 : i32
    %c0_i32_0 = arith.constant 0 : i32
    return %c0_i32, %arg0 : i32, i32
  }
}

module attributes {stable_mosaic.version = 11 : i64} {
  func.func @_affine_relu_conv1x1_kernel(%arg0: i32, %arg1: memref<12x512xf32, #tpu.memory_space<vmem>>, %arg2: memref<12x1xf32, #tpu.memory_space<vmem>>, %arg3: memref<12x1xf32, #tpu.memory_space<vmem>>, %arg4: memref<16x12xf32, #tpu.memory_space<vmem>>, %arg5: memref<16x512xf32, #tpu.memory_space<vmem>>) attributes {dimension_semantics = [#tpu.dimension_semantics<parallel>], iteration_bounds = array<i64: 1>, scalar_prefetch = 0 : i64, scratch_operands = 0 : i64, tpu.core_type = #tpu.core_type<tc>, window_params = [{transform_indices = @transform_0, window_bounds = array<i64: 12, 512>}, {pipeline_mode = #tpu.pipeline_mode<synchronous>, transform_indices = @transform_1, window_bounds = array<i64: 12, 1>}, {pipeline_mode = #tpu.pipeline_mode<synchronous>, transform_indices = @transform_2, window_bounds = array<i64: 12, 1>}, {pipeline_mode = #tpu.pipeline_mode<synchronous>, transform_indices = @transform_3, window_bounds = array<i64: 16, 12>}, {transform_indices = @transform_4, window_bounds = array<i64: 16, 512>}]} {
    %c0 = arith.constant 0 : index
    %c0_0 = arith.constant 0 : index
    %0 = vector.load %arg1[%c0, %c0_0] : memref<12x512xf32, #tpu.memory_space<vmem>>, vector<12x512xf32>
    %c0_1 = arith.constant 0 : index
    %c0_2 = arith.constant 0 : index
    %1 = vector.load %arg2[%c0_1, %c0_2] : memref<12x1xf32, #tpu.memory_space<vmem>>, vector<12x1xf32>
    %2 = vector.broadcast %1 : vector<12x1xf32> to vector<12x512xf32>
    %3 = arith.mulf %0, %2 : vector<12x512xf32>
    %c0_3 = arith.constant 0 : index
    %c0_4 = arith.constant 0 : index
    %4 = vector.load %arg3[%c0_3, %c0_4] : memref<12x1xf32, #tpu.memory_space<vmem>>, vector<12x1xf32>
    %5 = vector.broadcast %4 : vector<12x1xf32> to vector<12x512xf32>
    %6 = arith.addf %3, %5 : vector<12x512xf32>
    %cst = arith.constant 0.000000e+00 : f32
    %7 = vector.broadcast %cst : f32 to vector<12x512xf32>
    %8 = arith.maximumf %6, %7 : vector<12x512xf32>
    %c0_5 = arith.constant 0 : index
    %c0_6 = arith.constant 0 : index
    %9 = vector.load %arg4[%c0_5, %c0_6] : memref<16x12xf32, #tpu.memory_space<vmem>>, vector<16x12xf32>
    %10 = arith.truncf %9 : vector<16x12xf32> to vector<16x12xbf16>
    %11 = arith.truncf %8 : vector<12x512xf32> to vector<12x512xbf16>
    %cst_7 = arith.constant dense<0.000000e+00> : vector<16x512xf32>
    %12 = tpu.matmul %10, %11, %cst_7 {dimension_numbers = #tpu.dot_dimension_numbers<[1], [0], [0], [1], [0, 0, 1, 1], [], []>} : vector<16x12xbf16>, vector<12x512xbf16>, vector<16x512xf32> -> vector<16x512xf32>
    %c0_8 = arith.constant 0 : index
    %c0_9 = arith.constant 0 : index
    %13 = vector.load %arg5[%c0_8, %c0_9] : memref<16x512xf32, #tpu.memory_space<vmem>>, vector<16x512xf32>
    tpu.vector_store %arg5[%c0_8, %c0_9], %12 {strides = array<i32>} : memref<16x512xf32, #tpu.memory_space<vmem>>, vector<16x512xf32>,
    return
  }
  func.func @transform_0(%arg0: i32) -> (i32, i32) {
    %c0_i32 = arith.constant 0 : i32
    %c0_i32_0 = arith.constant 0 : i32
    return %c0_i32, %arg0 : i32, i32
  }
  func.func @transform_1(%arg0: i32) -> (i32, i32) {
    %c0_i32 = arith.constant 0 : i32
    %c0_i32_0 = arith.constant 0 : i32
    %c0_i32_1 = arith.constant 0 : i32
    return %c0_i32, %c0_i32_0 : i32, i32
  }
  func.func @transform_2(%arg0: i32) -> (i32, i32) {
    %c0_i32 = arith.constant 0 : i32
    %c0_i32_0 = arith.constant 0 : i32
    %c0_i32_1 = arith.constant 0 : i32
    return %c0_i32, %c0_i32_0 : i32, i32
  }
  func.func @transform_3(%arg0: i32) -> (i32, i32) {
    %c0_i32 = arith.constant 0 : i32
    %c0_i32_0 = arith.constant 0 : i32
    %c0_i32_1 = arith.constant 0 : i32
    return %c0_i32, %c0_i32_0 : i32, i32
  }
  func.func @transform_4(%arg0: i32) -> (i32, i32) {
    %c0_i32 = arith.constant 0 : i32
    %c0_i32_0 = arith.constant 0 : i32
    return %c0_i32, %arg0 : i32, i32
  }
}

</mosaic_0001>

<bundles_post_ra>
// kernel: dense_block_forward.6
= control target key start
LH: loop header
LB: loop body
LE: loop exit
PB: predicated region body
PF: predicated region fallthrough
CT: control target
= control target key end

     0   :  { %v187_v0 = vmov 0   ;;  %v188_v3 = vmov 839922192   ;;  %v28_v5 = vlaneseq  ;;  %vm69_vm0 = vcmask 1041408   ;;  %s256_s1 = inlined_call_operand.vmem [shape: f32[4,1], index: 1, kind: input, shape index: {}]   ;;  %s257_s2 = inlined_call_operand.vmem [shape: f32[4,1], index: 2, kind: input, shape index: {}]   ;;  %s258_s0 = inlined_call_operand.vmem [shape: f32[4,512], index: 0, kind: input, shape index: {}]   ;;  %s259_s3 = inlined_call_operand.vmem [shape: f32[16,4], index: 3, kind: input, shape index: {}]   ;;  %s260_s4 = inlined_call_operand.vmem [shape: f32[16,512], index: 4, kind: output, shape index: {}]  }
   0x1   :  { %186 = vset.pattern.permute.xlu0 %v187_v0  ;;  %v20_v1 = vld [vmem:[%s256_s1] sm:$0xf]  ;;  %114 = vmatprep.mubr.bf16.mxu0 %v187_v0  ;;  %v26_v4 = vunpack.c.l.s4 %v188_v3  ;;  %v19_v12 = vld [vmem:[%s258_s0 + $0x8] sm:$0xff]  ;;  %vm65_vm1 = vcmask 31744  }
   0x2   :  { %23 = vperm.xlu0 %186, %v20_v1   ;;  %157 = vmatprep.mubr.bf16.mxu1 %v187_v0  ;;  %v35_v2 = vld [vmem:[%s257_s2] sm:$0xf]  ;;  %v29_v7 = vshrl.u32 %v28_v5, 7  ;;  %v53_v26 = vld [vmem:[%s259_s3 + $0x8] sm:$0xff] }
   0x3   :  { %v27_v6 = vunpack.c.0.s8 %v26_v4  ;;  %v18_v11 = vld [vmem:[%s258_s0] sm:$0xff] }
   0x4   :  { %v52_v25 = vld [vmem:[%s259_s3] sm:$0xff] }
   0x5   :  { %v30_v8 = vsub.s32 %v27_v6, %v29_v7  ;;  %v54_v31 = vpack.c.bf16 %v53_v26, %v52_v25 }
   0x6   :  { %38 = vperm.xlu0 %186, %v35_v2  }
  0x81   :  { %v24_v9 = vpop.permute.xlu0 %23 }
  0x82   :  { %v31_v10 = vrot.slane %v24_v9, %v30_v8 }
  0x84   :  { %v33_v14 = vmul.f32 %v31_v10, %v18_v11  ;;  %v34_v15 = vmul.f32 %v31_v10, %v19_v12 }
  0x85   :  { %v39_v13 = vpop.permute.xlu0 %38 }
  0x86   :  { %v46_v16 = vrot.slane %v39_v13, %v30_v8 }
  0x88   :  { %v48_v17 = vadd.f32 %v46_v16, %v33_v14  ;;  %v49_v18 = vadd.f32 %v46_v16, %v34_v15 }
  0x8a   :  { %v50_v19 = vmax.f32 %v48_v17, 0.0  ;;  %v51_v20 = vmax.f32 %v49_v18, 0.0 }
  0x8c   :  { %v57_v21 = vcombine.high %v50_v19, %v50_v19  ;;  %v58_v22 = vcombine.high %v51_v20, %v51_v20  ;;  %v61_v23 = vpack.c.bf16 %v50_v19, %v50_v19  ;;  %v63_v24 = vpack.c.bf16 %v51_v20, %v51_v20 }
  0x8e   :  { %v62_v27 = vpack.c.bf16 %v57_v21, %v57_v21  ;;  %v64_v28 = vpack.c.bf16 %v58_v22, %v58_v22  ;;  %v71_v29 = vsel %vm69_vm0, %v61_v23, 0  ;;  %v77_v30 = vsel %vm69_vm0, %v63_v24, 0 }
  0x90   :  { %180 = vmatprep.subr.msk.bf16.mxu0 %vm69_vm0, %v62_v27  ;;  %182 = vmatprep.subr.msk.bf16.mxu1 %vm69_vm0, %v64_v28 }
  0x91   :  { %83 = vmatpush1.bf16.msra.mxu0 %v71_v29  ;;  %126 = vmatpush1.bf16.msra.mxu1 %v77_v30 }
  0x94   :  { %181 = vmatmul.mubr.msk.bf16.vlgmr.msra.gmra.mrb[0].mxu0 %vm65_vm1, %v54_v31  ;;  %183 = vmatmul.mubr.msk.bf16.vlgmr.msra.gmra.mrb[0].mxu1 %vm65_vm1, %v54_v31 }
 0x167   :  { %v116_v32 = vpop.f32.mrb[0].mxu0  ;;  %v159_v33 = vpop.f32.mrb[0].mxu1 }
 0x168   :  { %168 = vst [vmem:[%s260_s4] sm:$0xff] %v116_v32  ;;  %170 = vst [vmem:[%s260_s4 + $0x10] sm:$0xff] %v159_v33  ;;  %v118_v34 = vpop.f32.mrb[1].mxu0  ;;  %v161_v35 = vpop.f32.mrb[1].mxu1 }
 0x169   :  { %169 = vst [vmem:[%s260_s4 + $0x8] sm:$0xff] %v118_v34  ;;  %171 = vst [vmem:[%s260_s4 + $0x18] sm:$0xff] %v161_v35  ;;  %v120_v36 = vpop.f32.mrb[2].mxu0  ;;  %v163_v37 = vpop.f32.mrb[2].mxu1 }
 0x16a   :  { %172 = vst [vmem:[%s260_s4 + $0x20] sm:$0xff] %v120_v36  ;;  %174 = vst [vmem:[%s260_s4 + $0x30] sm:$0xff] %v163_v37  ;;  %v122_v38 = vpop.f32.mrb[3].mxu0  ;;  %v165_v39 = vpop.f32.mrb[3].mxu1 }
 0x16b   :  { %173 = vst [vmem:[%s260_s4 + $0x28] sm:$0xff] %v122_v38  ;;  %175 = vst [vmem:[%s260_s4 + $0x38] sm:$0xff] %v165_v39 }

// kernel: dense_block_forward.8
= control target key start
LH: loop header
LB: loop body
LE: loop exit
PB: predicated region body
PF: predicated region fallthrough
CT: control target
= control target key end

     0   :  { %v174_v0 = vmov 0   ;;  %vm57_vm0 = vcmask 1043456   ;;  %vm53_vm1 = vcmask 64512   ;;  %s248_s1 = inlined_call_operand.vmem [shape: f32[8,1], index: 1, kind: input, shape index: {}]   ;;  %s249_s2 = inlined_call_operand.vmem [shape: f32[8,1], index: 2, kind: input, shape index: {}]   ;;  %s250_s0 = inlined_call_operand.vmem [shape: f32[8,512], index: 0, kind: input, shape index: {}]   ;;  %s251_s3 = inlined_call_operand.vmem [shape: f32[16,8], index: 3, kind: input, shape index: {}]   ;;  %s252_s4 = inlined_call_operand.vmem [shape: f32[16,512], index: 4, kind: output, shape index: {}]  }
   0x1   :  { %173 = vset.pattern.permute.xlu0 %v174_v0  ;;  %v22_v1 = vld [vmem:[%s248_s1] sm:$0xff]  ;;  %102 = vmatprep.mubr.bf16.mxu0 %v174_v0  ;;  %v19_v3 = vld [vmem:[%s250_s0 + $0x8] sm:$0xff]  ;;  %v21_v5 = vld [vmem:[%s250_s0 + $0x18] sm:$0xff] }
   0x2   :  { %25 = vperm.xlu0 %173, %v22_v1   ;;  %145 = vmatprep.mubr.bf16.mxu1 %v174_v0  ;;  %v32_v2 = vld [vmem:[%s249_s2] sm:$0xff]  ;;  %v20_v7 = vld [vmem:[%s250_s0 + $0x10] sm:$0xff]  ;;  %v47_v22 = vld [vmem:[%s251_s3 + $0x8] sm:$0xff] }
   0x3   :  { %v18_v6 = vld [vmem:[%s250_s0] sm:$0xff] }
   0x4   :  { %v46_v21 = vld [vmem:[%s251_s3] sm:$0xff] }
   0x5   :  { %v48_v29 = vpack.c.bf16 %v47_v22, %v46_v21 }
   0x6   :  { %35 = vperm.xlu0 %173, %v32_v2  }
  0x81   :  { %v26_v4 = vpop.permute.xlu0 %25 }
  0x82   :  { %v29_v8 = vmul.f32 %v26_v4, %v19_v3  ;;  %v31_v9 = vmul.f32 %v26_v4, %v21_v5  ;;  %v28_v10 = vmul.f32 %v26_v4, %v18_v6  ;;  %v30_v11 = vmul.f32 %v26_v4, %v20_v7 }
  0x85   :  { %v36_v12 = vpop.permute.xlu0 %35 }
  0x86   :  { %v39_v13 = vadd.f32 %v36_v12, %v29_v8  ;;  %v41_v14 = vadd.f32 %v36_v12, %v31_v9  ;;  %v38_v15 = vadd.f32 %v36_v12, %v28_v10  ;;  %v40_v16 = vadd.f32 %v36_v12, %v30_v11 }
  0x88   :  { %v43_v17 = vmax.f32 %v39_v13, 0.0  ;;  %v45_v18 = vmax.f32 %v41_v14, 0.0  ;;  %v42_v19 = vmax.f32 %v38_v15, 0.0  ;;  %v44_v20 = vmax.f32 %v40_v16, 0.0 }
  0x8a   :  { %v50_v23 = vpack.c.bf16 %v43_v17, %v43_v17  ;;  %v52_v24 = vpack.c.bf16 %v45_v18, %v45_v18  ;;  %v49_v25 = vpack.c.bf16 %v42_v19, %v42_v19  ;;  %v51_v26 = vpack.c.bf16 %v44_v20, %v44_v20 }
  0x8c   :  { %168 = vmatprep.subr.msk.bf16.mxu0 %vm57_vm0, %v50_v23  ;;  %170 = vmatprep.subr.msk.bf16.mxu1 %vm57_vm0, %v52_v24  ;;  %v59_v27 = vsel %vm57_vm0, %v49_v25, 0  ;;  %v65_v28 = vsel %vm57_vm0, %v51_v26, 0 }
  0x8d   :  { %71 = vmatpush1.bf16.msra.mxu0 %v59_v27  ;;  %114 = vmatpush1.bf16.msra.mxu1 %v65_v28 }
  0x90   :  { %169 = vmatmul.mubr.msk.bf16.vlgmr.msra.gmra.mrb[0].mxu0 %vm53_vm1, %v48_v29  ;;  %171 = vmatmul.mubr.msk.bf16.vlgmr.msra.gmra.mrb[0].mxu1 %vm53_vm1, %v48_v29 }
 0x163   :  { %v104_v30 = vpop.f32.mrb[0].mxu0  ;;  %v147_v31 = vpop.f32.mrb[0].mxu1 }
 0x164   :  { %156 = vst [vmem:[%s252_s4] sm:$0xff] %v104_v30  ;;  %158 = vst [vmem:[%s252_s4 + $0x10] sm:$0xff] %v147_v31  ;;  %v106_v32 = vpop.f32.mrb[1].mxu0  ;;  %v149_v33 = vpop.f32.mrb[1].mxu1 }
 0x165   :  { %157 = vst [vmem:[%s252_s4 + $0x8] sm:$0xff] %v106_v32  ;;  %159 = vst [vmem:[%s252_s4 + $0x18] sm:$0xff] %v149_v33  ;;  %v108_v34 = vpop.f32.mrb[2].mxu0  ;;  %v151_v35 = vpop.f32.mrb[2].mxu1 }
 0x166   :  { %160 = vst [vmem:[%s252_s4 + $0x20] sm:$0xff] %v108_v34  ;;  %162 = vst [vmem:[%s252_s4 + $0x30] sm:$0xff] %v151_v35  ;;  %v110_v36 = vpop.f32.mrb[3].mxu0  ;;  %v153_v37 = vpop.f32.mrb[3].mxu1 }
 0x167   :  { %161 = vst [vmem:[%s252_s4 + $0x28] sm:$0xff] %v110_v36  ;;  %163 = vst [vmem:[%s252_s4 + $0x38] sm:$0xff] %v153_v37 }

// kernel: dense_block_forward.7
= control target key start
LH: loop header
LB: loop body
LE: loop exit
PB: predicated region body
PF: predicated region fallthrough
CT: control target
= control target key end

     0   :  { %s1330_s15 = smov 0   ;;  %s1332_s16 = smov 0   ;;  %s1636_s0 = inlined_call_operand.vmem [shape: f32[16,512], index: 0, kind: input, shape index: {}]   ;;  %s1637_s1 = inlined_call_operand.vmem [shape: f32[16,1], index: 1, kind: input, shape index: {}]   ;;  %s1638_s2 = inlined_call_operand.vmem [shape: f32[16,1], index: 2, kind: input, shape index: {}]   ;;  %s1639_s3 = inlined_call_operand.vmem [shape: f32[9,4,16], index: 3, kind: input, shape index: {}]   ;;  %s1640_s4 = inlined_call_operand.vmem [shape: f32[4,512], index: 4, kind: output, shape index: {}]  }
   0x1   :  { %s1334_s17 = smov 0  }
   0x2 LB: > { %s1054_s18 = sadd.s32 4294967295, %s1294_s17   ;;  %s1347_s19 = sadd.s32 1, %s1294_s17   ;;  %s1294_s17 = sphi %s1334_s17, %s1659_s17   ;;  %s1290_s16 = sphi %s1332_s16, %s1658_s16   ;;  %s1286_s15 = sphi %s1330_s15, %s1657_s15  }
   0x3   : > { %s18_s20 = ssub.s32 %s1294_s17, %s1347_s19  ;;  %s21_s21 = sadd.s32 1, %s1290_s16 }
   0x4   : > { %p19_p0 = scmp.eq.s32.totalorder %s18_s20, 0  ;;  %p28_p1 = scmp.ne.s32.totalorder %s1290_s16, %s1286_s15 }
   0x5   : > { %p29_p2 = scmp.eq.s32.totalorder %s1294_s17, 0  ;;  %p1057_p4 = scmp.ge.s32.totalorder %s1294_s17, 2 }
   0x6   : > { %s1356_s22 = scalar_select %p19_p0, %s1290_s16, %s21_s21  }
   0x7   : > { %p30_p3 = por %p29_p2, %p28_p1  ;;  %152 = sbr.rel (%p1057_p4) target bundleno = 21 (0x15), region = 28 }
   0xe   : > { %155 = sbr.rel (!%p30_p3) target bundleno = 21 (0x15), region = 32  ;;  %s157_s23 = sand.u32 (%p30_p3), 1, %s1290_s16  }
   0xf   : > { %s1126_s24 = sshll.u32 (%p30_p3), %s1294_s17, 4  ;;  %s1058_s25 = sshll.u32 (%p30_p3), %s157_s23, 5 }
  0x10   : > { %s162_s28 = scalar_lea.vmem (%p30_p3), %s1636_s0, %s1126_s24  ;;  %s159_s29 = scalar_lea.vmem (%p30_p3), [#allocation2], %s1058_s25 }
  0x11   : > { %v175_v0 = vld [vmem:[%s162_s28] sm:$0xff] (%p30_p3)  ;;  %v177_v1 = vld [vmem:[%s162_s28 + $0x8] sm:$0xff] (%p30_p3) }
  0x12   : > { %v179_v2 = vld [vmem:[%s162_s28 + $0x20] sm:$0xff] (%p30_p3)  ;;  %176 = vst [vmem:[%s159_s29] sm:$0xff] (%p30_p3), %v175_v0  ;;  %178 = vst [vmem:[%s159_s29 + $0x8] sm:$0xff] (%p30_p3), %v177_v1  ;;  %v181_v3 = vld [vmem:[%s162_s28 + $0x28] sm:$0xff] (%p30_p3) }
  0x13   : > { %180 = vst [vmem:[%s159_s29 + $0x10] sm:$0xff] (%p30_p3), %v179_v2  ;;  %182 = vst [vmem:[%s159_s29 + $0x18] sm:$0xff] (%p30_p3), %v181_v3 }
  0x15 PF: > { %p1061_p5 = scmp.ge.s32.totalorder %s1294_s17, 1  ;;  %p187_p6 = scmp.lt.s32.totalorder %s1294_s17, 3 }
  0x17   : > { %p188_p7 = pnand %p1061_p5, %p187_p6 }
  0x18   : > { %v247_v4 = vld [vmem:[%s1638_s2] sm:$0xff] (!%p188_p7)  ;;  %v1296_v6 = vmov (!%p188_p7), 0   ;;  %v248_v7 = vld [vmem:[%s1638_s2 + $0x8] sm:$0xff] (!%p188_p7)  ;;  %s194_s12 = sand.u32 (!%p188_p7), 1, %s1286_s15   ;;  %v1093_v29 = vld [vmem:[%s1639_s3 + $0x10] sm:$0xf] (!%p188_p7)  ;;  %v267_v35 = vlaneseq (!%p188_p7) }
  0x19   : > { %191 = sbr.rel (%p188_p7) target bundleno = 549 (0x225), region = 55  ;;  %v231_v5 = vld [vmem:[%s1637_s1] sm:$0xff] (!%p188_p7)  ;;  %1191 = vset.pattern.permute.xlu1 (!%p188_p7), %v1296_v6  ;;  %1190 = vset.pattern.permute.xlu0 (!%p188_p7), %v1296_v6  ;;  %v232_v8 = vld [vmem:[%s1637_s1 + $0x8] sm:$0xff] (!%p188_p7)  ;;  %s1062_s13 = sshll.u32 (!%p188_p7), %s194_s12, 5  ;;  %v626_v34 = vpack.c.bf16 (!%p188_p7), %v1093_v29, %v1093_v29  ;;  %vm371_vm0 = vcmask (!%p188_p7), 130048  }
  0x1a   : > { %251 = vperm.xlu1 (!%p188_p7), %1191, %v247_v4   ;;  %235 = vperm.xlu0 (!%p188_p7), %1190, %v231_v5   ;;  %s196_s14 = scalar_lea.vmem (!%p188_p7), [#allocation2], %s1062_s13  ;;  %s1297_s21 = smov (!%p188_p7), 16   ;;  %v1388_v36 = vand.u32 (!%p188_p7), 127, %v267_v35  ;;  %v1065_v59 = vld [vmem:[%s1639_s3 + $0x4] sm:$0xf] (!%p188_p7) }
  0x1b   : > { %664 = vmatprep.mubr.bf16.mxu0 (!%p188_p7), %v1296_v6  ;;  %407 = vmatprep.mubr.bf16.mxu1 (!%p188_p7), %v1296_v6  ;;  %v227_v9 = vld [vmem:[%s196_s14] sm:$0xff] (!%p188_p7)  ;;  %v228_v10 = vld [vmem:[%s196_s14 + $0x8] sm:$0xff] (!%p188_p7)  ;;  %v229_v15 = vld [vmem:[%s196_s14 + $0x10] sm:$0xff] (!%p188_p7)  ;;  %s1298_s23 = smov (!%p188_p7), 127   ;;  %s1299_s24 = smov (!%p188_p7), 17   ;;  %v368_v4 = vpack.c.bf16 (!%p188_p7), %v1065_v59, %v1065_v59 }
  0x1c   : > { %v230_v16 = vld [vmem:[%s196_s14 + $0x18] sm:$0xff] (!%p188_p7)  ;;  %s1300_s25 = smov (!%p188_p7), 113   ;;  %s1301_s26 = smov (!%p188_p7), 15   ;;  %v1391_v37 = vadd.s32 (!%p188_p7), 128, %v1388_v36  ;;  %v274_v39 = vand.u32 (!%p188_p7), 15, %v1388_v36  ;;  %v346_v40 = vadd.s32 (!%p188_p7), 4294967280, %v1388_v36 }
  0x1d   : > { %s1302_s27 = smov (!%p188_p7), 112   ;;  %s1303_s28 = smov (!%p188_p7), 1   ;;  %vm341_vm1 = vcmp.lt.s32.totalorder (!%p188_p7), %v1388_v36, 16  ;;  %v307_v50 = vadd.s32 (!%p188_p7), 4294967279, %v1388_v36  ;;  %vm683_vm5 = vcmp.lt.s32.totalorder (!%p188_p7), %v1388_v36, 127  ;;  %vm302_vm11 = vcmp.lt.s32.totalorder (!%p188_p7), %v1388_v36, 17 }
  0x1e   : > { %256 = vperm.xlu1 (!%p188_p7), %1191, %v248_v7   ;;  %240 = vperm.xlu0 (!%p188_p7), %1190, %v232_v8   ;;  %s1304_s29 = smov (!%p188_p7), 111   ;;  %v281_v38 = vand.u32 (!%p188_p7), 15, %v1391_v37  ;;  %v689_v42 = vadd.s32 (!%p188_p7), 1, %v1391_v37  ;;  %v1399_v43 = vadd.s32 (!%p188_p7), 1, %v274_v39  ;;  %vm354_vm2 = vcmp.ge.s32.totalorder (!%p188_p7), %v346_v40, 0 }
  0x1f   : > { %v1404_v51 = vadd.s32 (!%p188_p7), 4294967295, %v274_v39  ;;  %v767_v53 = vadd.s32 (!%p188_p7), 15, %v1391_v37  ;;  %vm1066_vm8 = vmpackc.low (!%p188_p7), %vm354_vm2, %vm354_vm2  ;;  %vm317_vm10 = vcmp.ge.s32.totalorder (!%p188_p7), %v307_v50, 0  ;;  %vm761_vm2 = vcmp.lt.s32.totalorder (!%p188_p7), %v1388_v36, 113 }
  0x20   : > { %v1396_v41 = vadd.s32 1, %v281_v38  ;;  %vm695_vm4 = vcmp.lt.s32.totalorder %v689_v42, 256  ;;  %vm479_vm6 = vcmp.lt.s32.totalorder %v1399_v43, 16  ;;  %v310_v52 = vadd.s32 4294967295, %v281_v38 }
  0x21   : > { %vm311_vm9 = vcmp.ge.s32.totalorder %v1404_v51, 0  ;;  %vm1445_vm14 = vmpackc.low %vm479_vm6, %vm479_vm6  ;;  %v845_v39 = vadd.s32 16, %v1391_v37 }
  0x22   : > { %vm480_vm3 = vcmp.lt.s32.totalorder %v1396_v41, 16  ;;  %vm312_vm13 = vcmp.ge.s32.totalorder %v310_v52, 0  ;;  %vm1455_vm15 = vmand %vm311_vm9, %vm317_vm10 }
  0x23   : > { %vm1423_vm7 = vmand %vm480_vm3, %vm695_vm4 }
  0x24   : > { %vm1096_vm12 = vmpackc.low %vm1423_vm7, %vm1423_vm7 }
  0x25   : > { %vm1468_vm4 = vmpackc.low %vm312_vm13, %vm312_vm13 }
  0x99   : > { %v252_v11 = vpop.permute.xlu1 %251  ;;  %v236_v12 = vpop.permute.xlu0 %235 }
  0x9a   : > { %v243_v13 = vmul.f32 %v236_v12, %v227_v9  ;;  %v244_v14 = vmul.f32 %v236_v12, %v228_v10  ;;  %v1095_v12 = vld [vmem:[%s1639_s3 + $0x14] sm:$0xf] }
  0x9c   : > { %v259_v18 = vadd.f32 %v252_v11, %v243_v13  ;;  %v260_v19 = vadd.f32 %v252_v11, %v244_v14 }
  0x9d   : > { %v241_v17 = vpop.permute.xlu0 %240  ;;  %v257_v22 = vpop.permute.xlu1 %256 }
  0x9e   : > { %v245_v20 = vmul.f32 %v241_v17, %v229_v15  ;;  %v246_v21 = vmul.f32 %v241_v17, %v230_v16  ;;  %v263_v25 = vmax.f32 %v259_v18, 0.0  ;;  %v264_v26 = vmax.f32 %v260_v19, 0.0 }
  0xa0   : > { %v261_v23 = vadd.f32 %v257_v22, %v245_v20  ;;  %v262_v24 = vadd.f32 %v257_v22, %v246_v21  ;;  %v704_v22 = vpack.c.bf16 %v1095_v12, %v1095_v12 }
  0xa2   : > { %v265_v27 = vmax.f32 %v261_v23, 0.0  ;;  %v266_v28 = vmax.f32 %v262_v24, 0.0  ;;  %v473_v23 = vadd.s32 4294967281, %v1388_v36 }
  0xa4   : > { %v1197_v30 = vpack.i.bf16 %v266_v28, %v264_v26  ;;  %v628_v31 = vpack.c.bf16 %v266_v28, %v264_v26  ;;  %v1192_v32 = vpack.i.bf16 %v265_v27, %v263_v25  ;;  %v627_v33 = vpack.c.bf16 %v265_v27, %v263_v25 }
  0xa5   : > { %vm483_vm10 = vcmp.ge.s32.totalorder %v473_v23, 0 }
  0xa6   : > { %1198 = vrot.lane.b32.xlu1 %v1197_v30, %s1297_s21  ;;  %632 = vmatprep.subr.bf16.mxu0 %v628_v31 }
  0xa7   : > { %1193 = vrot.lane.b32.xlu0 %v1192_v32, %s1297_s21  ;;  %633 = vmatpush1.bf16.msra.mxu0 %v627_v33 }
  0xaa   : > { %1208 = vrot.lane.b32.xlu1 %v1197_v30, %s1298_s23  ;;  %1094 = vmatmul.mubr.msk.bf16.vlgmr.msra.gmra.mrb[0].mxu0 %vm371_vm0, %v626_v34 }
  0xab   : > { %1203 = vrot.lane.b32.xlu0 %v1192_v32, %s1298_s23  ;;  %742 = vmatprep.mubr.bf16.mxu0 %v1296_v6 }
  0xae   : > { %1218 = vrot.lane.b32.xlu1 %v1197_v30, %s1299_s24 }
  0xaf   : > { %1213 = vrot.lane.b32.xlu0 %v1192_v32, %s1299_s24 }
  0xb2   : > { %1228 = vrot.lane.b32.xlu1 %v1197_v30, %s1300_s25 }
  0xb3   : > { %1223 = vrot.lane.b32.xlu0 %v1192_v32, %s1300_s25  ;;  %s1063_s25 = sshll.u32 %s1054_s18, 1 }
  0xb4   : > { %p221_p8 = scmp.lt.s32.totalorder %s1063_s25, 3 }
  0xb6   : > { %1238 = vrot.lane.b32.xlu1 %v1197_v30, %s1301_s26  ;;  %s1661_s25 = smov (!%p221_p8, %s1063_s25), 3 }
  0xb7   : > { %1233 = vrot.lane.b32.xlu0 %v1192_v32, %s1301_s26  ;;  %s1064_s26 = sshll.u32 %s1661_s25, 2 }
  0xba   : > { %1248 = vrot.lane.b32.xlu1 %v1197_v30, %s1302_s27 }
  0xbb   : > { %1243 = vrot.lane.b32.xlu0 %v1192_v32, %s1302_s27 }
  0xbe   : > { %1258 = vrot.lane.b32.xlu1 %v1197_v30, %s1303_s28 }
  0xbf   : > { %1253 = vrot.lane.b32.xlu0 %v1192_v32, %s1303_s28 }
  0xc2   : > { %1268 = vrot.lane.b32.xlu1 %v1197_v30, %s1304_s29 }
  0xc3   : > { %1263 = vrot.lane.b32.xlu0 %v1192_v32, %s1304_s29  ;;  %s224_s29 = scalar_lea.vmem %s1640_s4, %s1064_s26 }
 0x118   : > { %v1199_v44 = vpop.permute.xlu1 %1198 }
 0x119   : > { %v1201_v45 = vunpack.i.h.bf16 %v1199_v44  ;;  %v1200_v46 = vunpack.i.l.bf16 %v1199_v44  ;;  %v1194_v47 = vpop.permute.xlu0 %1193 }
 0x11a   : > { %v1196_v48 = vunpack.i.h.bf16 %v1194_v47  ;;  %v1195_v49 = vunpack.i.l.bf16 %v1194_v47  ;;  %v329_v47 = vld [vmem:[%s1639_s3] sm:$0xf] }
 0x11c   : > { %v1209_v54 = vpop.permute.xlu1 %1208  ;;  %v342_v55 = vsel %vm341_vm1, %v1195_v49, %v1200_v46  ;;  %v343_v56 = vsel %vm341_vm1, %v1196_v48, %v1201_v45  ;;  %v344_v57 = vsel %vm341_vm1, %v1200_v46, %v1195_v49  ;;  %v345_v58 = vsel %vm341_vm1, %v1201_v45, %v1196_v48 }
 0x11d   : > { %v1211_v61 = vunpack.i.h.bf16 %v1209_v54  ;;  %v1210_v62 = vunpack.i.l.bf16 %v1209_v54  ;;  %v1204_v63 = vpop.permute.xlu0 %1203  ;;  %v370_v0 = vpack.c.bf16 %v343_v56, %v342_v55  ;;  %v1067_v1 = vpack.c.bf16 %v345_v58, %v344_v57 }
 0x11e   : > { %v1206_v2 = vunpack.i.h.bf16 %v1204_v63  ;;  %v1205_v3 = vunpack.i.l.bf16 %v1204_v63  ;;  %vm773_vm1 = vcmp.lt.s32.totalorder %v767_v53, 256  ;;  %v330_v57 = vpack.c.bf16 %v329_v47, %v329_v47 }
 0x11f   : > { %375 = vmatprep.subr.bf16.mxu1 %v370_v0  ;;  %vm1488_vm7 = vmand %vm312_vm13, %vm773_vm1  ;;  %vm851_vm1 = vcmp.lt.s32.totalorder %v845_v39, 256 }
 0x120   : > { %v685_v5 = vsel %vm683_vm5, %v1206_v2, %v1211_v61  ;;  %v687_v7 = vsel %vm683_vm5, %v1211_v61, %v1206_v2  ;;  %v684_v8 = vsel %vm683_vm5, %v1205_v3, %v1210_v62  ;;  %v686_v9 = vsel %vm683_vm5, %v1210_v62, %v1205_v3  ;;  %1068 = vmatpush1.bf16.msk.msra.mxu1 %vm1066_vm8, %v1067_v1  ;;  %v1219_v10 = vpop.permute.xlu1 %1218  ;;  %vm1073_vm5 = vmpackc.low %vm1455_vm15, %vm1455_vm15  ;;  %v1103_v62 = vld [vmem:[%s1639_s3 + $0x18] sm:$0xf] }
 0x121   : > { %v1097_v13 = vpack.c.bf16 %v687_v7, %v686_v9  ;;  %v1100_v14 = vpack.c.bf16 %v685_v5, %v684_v8  ;;  %v1221_v15 = vunpack.i.h.bf16 %v1219_v10  ;;  %v1220_v16 = vunpack.i.l.bf16 %v1219_v10  ;;  %v1214_v17 = vpop.permute.xlu0 %1213  ;;  %vm1524_vm13 = vmand %vm479_vm6, %vm483_vm10 }
 0x122   : > { %v1216_v19 = vunpack.i.h.bf16 %v1214_v17  ;;  %v1215_v20 = vunpack.i.l.bf16 %v1214_v17  ;;  %vm468_vm8 = vcmp.lt.s32.totalorder %v1388_v36, 15  ;;  %vm839_vm15 = vcmp.lt.s32.totalorder %v1388_v36, 112  ;;  %vm1078_vm6 = vmpackc.low %vm480_vm3, %vm480_vm3 }
 0x123   : > { %1069 = vmatmul.mubr.msk.bf16.vlgmr.msra.gmra.mrb[0].mxu1 %vm371_vm0, %v368_v4  ;;  %1098 = vmatprep.subr.msk.bf16.mxu0 %vm1096_vm12, %v1097_v13  ;;  %vm1107_vm12 = vmpackc.low %vm311_vm9, %vm311_vm9  ;;  %v923_v7 = vadd.s32 17, %v1391_v37  ;;  %v782_v8 = vpack.c.bf16 %v1103_v62, %v1103_v62  ;;  %v559_v9 = vadd.s32 4294967295, %v1388_v36 }
 0x124   : > { %v304_v24 = vsel %vm302_vm11, %v1216_v19, %v1221_v15  ;;  %v306_v25 = vsel %vm302_vm11, %v1221_v15, %v1216_v19  ;;  %v303_v26 = vsel %vm302_vm11, %v1215_v20, %v1220_v16  ;;  %v305_v27 = vsel %vm302_vm11, %v1220_v16, %v1215_v20  ;;  %1101 = vmatpush1.bf16.msk.msra.mxu0 %vm1445_vm14, %v1100_v14  ;;  %v1229_v28 = vpop.permute.xlu1 %1228  ;;  %vm1104_vm11 = vmpackc.low %vm1488_vm7, %vm1488_vm7 }
 0x125   : > { %v1071_v29 = vpack.c.bf16 %v304_v24, %v303_v26  ;;  %v1074_v30 = vpack.c.bf16 %v306_v25, %v305_v27  ;;  %v1231_v31 = vunpack.i.h.bf16 %v1229_v28  ;;  %v1230_v32 = vunpack.i.l.bf16 %v1229_v28  ;;  %v1224_v33 = vpop.permute.xlu0 %1223  ;;  %451 = vmatprep.mubr.bf16.mxu1 %v1296_v6  ;;  %vm1112_vm7 = vmpackc.low %vm851_vm1, %vm851_vm1  ;;  %v1077_v26 = vld [vmem:[%s1639_s3 + $0x8] sm:$0xf] }
 0x126   : > { %v1226_v35 = vunpack.i.h.bf16 %v1224_v33  ;;  %v1225_v38 = vunpack.i.l.bf16 %v1224_v33  ;;  %vm561_vm10 = vcmp.ge.s32.totalorder %v559_v9, 0 }
 0x127   : > { %1072 = vmatprep.subr.msk.bf16.mxu1 %vm1468_vm4, %v1071_v29  ;;  %1102 = vmatmul.mubr.msk.bf16.vlgmr.msra.gmra.mrb[0].mxu0 %vm371_vm0, %v704_v22 }
 0x128   : > { %v763_v40 = vsel %vm761_vm2, %v1226_v35, %v1231_v31  ;;  %v765_v42 = vsel %vm761_vm2, %v1231_v31, %v1226_v35  ;;  %v762_v44 = vsel %vm761_vm2, %v1225_v38, %v1230_v32  ;;  %v764_v45 = vsel %vm761_vm2, %v1230_v32, %v1225_v38  ;;  %1075 = vmatpush1.bf16.msk.msra.mxu1 %vm1073_vm5, %v1074_v30  ;;  %v1239_v46 = vpop.permute.xlu1 %1238  ;;  %vm1081_vm2 = vmpackc.low %vm1524_vm13, %vm1524_vm13 }
 0x129   : > { %v1105_v48 = vpack.c.bf16 %v765_v42, %v764_v45  ;;  %v1108_v49 = vpack.c.bf16 %v763_v40, %v762_v44  ;;  %v1241_v50 = vunpack.i.h.bf16 %v1239_v46  ;;  %v1240_v52 = vunpack.i.l.bf16 %v1239_v46  ;;  %v1234_v53 = vpop.permute.xlu0 %1233  ;;  %820 = vmatprep.mubr.bf16.mxu0 %v1296_v6  ;;  %vm1580_vm13 = vmand %vm311_vm9, %vm561_vm10  ;;  %v1111_v40 = vld [vmem:[%s1639_s3 + $0x1c] sm:$0xf] }
 0x12a   : > { %v1236_v54 = vunpack.i.h.bf16 %v1234_v53  ;;  %v1235_v55 = vunpack.i.l.bf16 %v1234_v53  ;;  %vm554_vm5 = vcmp.lt.s32.totalorder %v1388_v36, 1  ;;  %v497_v38 = vpack.c.bf16 %v1077_v26, %v1077_v26  ;;  %vm1089_vm9 = vmpackc.low %vm1580_vm13, %vm1580_vm13 }
 0x12b   : > { %1106 = vmatprep.subr.msk.bf16.mxu0 %vm1104_vm11, %v1105_v48  ;;  %vm917_vm11 = vcmp.lt.s32.totalorder %v1388_v36, 111  ;;  %v860_v46 = vpack.c.bf16 %v1111_v40, %v1111_v40  ;;  %v1085_v48 = vld [vmem:[%s1639_s3 + $0xc] sm:$0xf] }
 0x12c   : > { %v470_v58 = vsel %vm468_vm8, %v1236_v54, %v1241_v50  ;;  %v472_v59 = vsel %vm468_vm8, %v1241_v50, %v1236_v54  ;;  %v469_v60 = vsel %vm468_vm8, %v1235_v55, %v1240_v52  ;;  %v471_v43 = vsel %vm468_vm8, %v1240_v52, %v1235_v55  ;;  %1109 = vmatpush1.bf16.msk.msra.mxu0 %vm1107_vm12, %v1108_v49  ;;  %v1249_v61 = vpop.permute.xlu1 %1248  ;;  %v1116_v49 = vld [vmem:[%s1639_s3 + $0x20] sm:$0xf] }
 0x12d   : > { %v1079_v63 = vpack.c.bf16 %v470_v58, %v469_v60  ;;  %v1082_v0 = vpack.c.bf16 %v472_v59, %v471_v43  ;;  %v1251_v1 = vunpack.i.h.bf16 %v1249_v61  ;;  %v1250_v2 = vunpack.i.l.bf16 %v1249_v61  ;;  %v1244_v3 = vpop.permute.xlu0 %1243 }
 0x12e   : > { %v1246_v4 = vunpack.i.h.bf16 %v1244_v3  ;;  %v1245_v5 = vunpack.i.l.bf16 %v1244_v3  ;;  %vm929_vm8 = vcmp.lt.s32.totalorder %v923_v7, 256  ;;  %v575_v36 = vpack.c.bf16 %v1085_v48, %v1085_v48 }
 0x12f   : > { %1076 = vmatmul.mubr.msk.bf16.vlgmr.msra.gmra.mrb[0].mxu1 %vm371_vm0, %v330_v57  ;;  %1080 = vmatprep.subr.msk.bf16.mxu1 %vm1078_vm6, %v1079_v63  ;;  %vm1572_vm12 = vmand %vm480_vm3, %vm929_vm8  ;;  %v938_v50 = vpack.c.bf16 %v1116_v49, %v1116_v49 }
 0x130   : > { %v841_v10 = vsel %vm839_vm15, %v1246_v4, %v1251_v1  ;;  %v843_v12 = vsel %vm839_vm15, %v1251_v1, %v1246_v4  ;;  %v840_v13 = vsel %vm839_vm15, %v1245_v5, %v1250_v2  ;;  %v842_v37 = vsel %vm839_vm15, %v1250_v2, %v1245_v5  ;;  %1083 = vmatpush1.bf16.msk.msra.mxu1 %vm1081_vm2, %v1082_v0  ;;  %v1259_v14 = vpop.permute.xlu1 %1258  ;;  %vm1117_vm3 = vmpackc.low %vm1572_vm12, %vm1572_vm12 }
 0x131   : > { %v861_v15 = vpack.c.bf16 %v841_v10, %v840_v13  ;;  %v1113_v16 = vpack.c.bf16 %v843_v12, %v842_v37  ;;  %v1261_v17 = vunpack.i.h.bf16 %v1259_v14  ;;  %v1260_v18 = vunpack.i.l.bf16 %v1259_v14  ;;  %v1254_v19 = vpop.permute.xlu0 %1253  ;;  %535 = vmatprep.mubr.bf16.mxu1 %v1296_v6 }
 0x132   : > { %v1256_v20 = vunpack.i.h.bf16 %v1254_v19  ;;  %v1255_v22 = vunpack.i.l.bf16 %v1254_v19 }
 0x133   : > { %1110 = vmatmul.mubr.msk.bf16.vlgmr.msra.gmra.mrb[0].mxu0 %vm371_vm0, %v782_v8  ;;  %1114 = vmatprep.subr.msk.bf16.mxu0 %vm1112_vm7, %v1113_v16 }
 0x134   : > { %v556_v23 = vsel %vm554_vm5, %v1256_v20, %v1261_v17  ;;  %v555_v24 = vsel %vm554_vm5, %v1255_v22, %v1260_v18  ;;  %867 = vmatpush1.bf16.msra.mxu0 %v861_v15  ;;  %v1269_v25 = vpop.permute.xlu1 %1268  ;;  %898 = vmatprep.mubr.bf16.mxu0 %v1296_v6  ;;  %v558_v35 = vsel %vm554_vm5, %v1261_v17, %v1256_v20 }
 0x135   : > { %v1087_v27 = vpack.c.bf16 %v556_v23, %v555_v24  ;;  %v1271_v28 = vunpack.i.h.bf16 %v1269_v25  ;;  %v1270_v29 = vunpack.i.l.bf16 %v1269_v25  ;;  %v1264_v30 = vpop.permute.xlu0 %1263  ;;  %v557_v41 = vsel %vm554_vm5, %v1260_v18, %v1255_v22 }
 0x136   : > { %v1266_v32 = vunpack.i.h.bf16 %v1264_v30  ;;  %v1265_v33 = vunpack.i.l.bf16 %v1264_v30  ;;  %v1090_v21 = vpack.c.bf16 %v558_v35, %v557_v41 }
 0x137   : > { %1088 = vmatprep.subr.msk.bf16.mxu1 %vm1468_vm4, %v1087_v27 }
 0x138   : > { %v921_v39 = vsel %vm917_vm11, %v1271_v28, %v1266_v32  ;;  %v920_v51 = vsel %vm917_vm11, %v1270_v29, %v1265_v33  ;;  %v919_v44 = vsel %vm917_vm11, %v1266_v32, %v1271_v28  ;;  %v918_v45 = vsel %vm917_vm11, %v1265_v33, %v1270_v29 }
 0x139   : > { %v1118_v42 = vpack.c.bf16 %v921_v39, %v920_v51  ;;  %v1121_v47 = vpack.c.bf16 %v919_v44, %v918_v45 }
 0x13b   : > { %1084 = vmatmul.mubr.msk.bf16.vlgmr.msra.gmra.mrb[0].mxu1 %vm371_vm0, %v497_v38  ;;  %1119 = vmatprep.subr.msk.bf16.mxu0 %vm1117_vm3, %v1118_v42 }
 0x13c   : > { %1091 = vmatpush1.bf16.msk.msra.mxu1 %vm1089_vm9, %v1090_v21  ;;  %613 = vmatprep.mubr.bf16.mxu1 %v1296_v6 }
 0x13f   : > { %1115 = vmatmul.mubr.msk.bf16.vlgmr.msra.gmra.mrb[0].mxu0 %vm371_vm0, %v860_v46 }
 0x140   : > { %1122 = vmatpush1.bf16.msk.msra.mxu0 %vm1445_vm14, %v1121_v47  ;;  %976 = vmatprep.mubr.bf16.mxu0 %v1296_v6 }
 0x147   : > { %1092 = vmatmul.mubr.msk.bf16.vlgmr.msra.gmra.mrb[0].mxu1 %vm371_vm0, %v575_v36 }
 0x14b   : > { %1123 = vmatmul.mubr.msk.bf16.vlgmr.msra.gmra.mrb[0].mxu0 %vm371_vm0, %v938_v50 }
 0x21a   : > { %v615_v11 = vpop.f32.mrb[0].mxu1 }
 0x21b   : > { %v617_v52 = vpop.f32.mrb[1].mxu1 }
 0x21c   : > { %v619_v53 = vpop.f32.mrb[2].mxu1 }
 0x21d   : > { %v620_v54 = vpop.f32.mrb[3].mxu1 }
 0x21e   : > { %v978_v55 = vpop.f32.mrb[0].mxu0 }
 0x21f   : > { %v1127_v6 = vadd.f32 %v978_v55, %v615_v11  ;;  %v980_v56 = vpop.f32.mrb[1].mxu0 }
 0x220   : > { %v1128_v57 = vadd.f32 %v980_v56, %v617_v52  ;;  %v982_v58 = vpop.f32.mrb[2].mxu0 }
 0x221   : > { %v983_v59 = vpop.f32.mrb[3].mxu0 }
 0x222   : > { %v989_v60 = vcombine.low %v1127_v6, %v1128_v57 }
 0x224   : > { %991 = vst [vmem:[%s224_s29] sm:$0xff] %v989_v60 }
 0x225 PF: > { %p11_p9 = scmp.ge.s32.totalorder %s1347_s19, 4   ;;  %s1657_s15 = smov %s1290_s16 }
 0x226   : > { %s1658_s16 = smov %s1356_s22  ;;  %s1659_s17 = smov %s1347_s19 }
 0x227   :  { %13 = sbr.rel (!%p11_p9) target bundleno = 2 (0x2), region = 102 }

// kernel: dense_block_forward.10
= control target key start
LH: loop header
LB: loop body
LE: loop exit
PB: predicated region body
PF: predicated region fallthrough
CT: control target
= control target key end

     0   :  { %v203_v0 = vmov 0   ;;  %vm85_vm0 = vcmask 1045504   ;;  %vm81_vm1 = vcmask 97280   ;;  %s295_s2 = inlined_call_operand.vmem [shape: f32[12,1], index: 2, kind: input, shape index: {}]   ;;  %s296_s1 = inlined_call_operand.vmem [shape: f32[12,1], index: 1, kind: input, shape index: {}]   ;;  %s297_s0 = inlined_call_operand.vmem [shape: f32[12,512], index: 0, kind: input, shape index: {}]   ;;  %s298_s3 = inlined_call_operand.vmem [shape: f32[16,12], index: 3, kind: input, shape index: {}]   ;;  %s299_s4 = inlined_call_operand.vmem [shape: f32[16,512], index: 4, kind: output, shape index: {}]  }
   0x1   :  { %202 = vset.pattern.permute.xlu1 %v203_v0  ;;  %201 = vset.pattern.permute.xlu0 %v203_v0  ;;  %v46_v1 = vld [vmem:[%s295_s2] sm:$0xff]  ;;  %v47_v3 = vld [vmem:[%s295_s2 + $0x8] sm:$0xf]  ;;  %v20_v7 = vld [vmem:[%s297_s0 + $0x10] sm:$0xff] }
   0x2   :  { %v26_v2 = vld [vmem:[%s296_s1] sm:$0xff]  ;;  %50 = vperm.xlu1 %202, %v46_v1   ;;  %v27_v4 = vld [vmem:[%s296_s1 + $0x8] sm:$0xf]  ;;  %130 = vmatprep.mubr.bf16.mxu0 %v203_v0  ;;  %v21_v8 = vld [vmem:[%s297_s0 + $0x18] sm:$0xff] }
   0x3   :  { %30 = vperm.xlu0 %201, %v26_v2   ;;  %173 = vmatprep.mubr.bf16.mxu1 %v203_v0  ;;  %v18_v5 = vld [vmem:[%s297_s0] sm:$0xff]  ;;  %v19_v6 = vld [vmem:[%s297_s0 + $0x8] sm:$0xff]  ;;  %v24_v17 = vld [vmem:[%s297_s0 + $0x30] sm:$0xf] }
   0x4   :  { %v22_v15 = vld [vmem:[%s297_s0 + $0x20] sm:$0xf]  ;;  %v23_v16 = vld [vmem:[%s297_s0 + $0x28] sm:$0xf]  ;;  %v25_v18 = vld [vmem:[%s297_s0 + $0x38] sm:$0xf] }
   0x5   :  { %v74_v41 = vld [vmem:[%s298_s3] sm:$0xff]  ;;  %v75_v42 = vld [vmem:[%s298_s3 + $0x8] sm:$0xff] }
   0x6   :  { %55 = vperm.xlu1 %202, %v47_v3   ;;  %v76_v49 = vpack.c.bf16 %v75_v42, %v74_v41 }
   0x7   :  { %35 = vperm.xlu0 %201, %v27_v4  }
  0x81   :  { %v51_v9 = vpop.permute.xlu1 %50 }
  0x82   :  { %v31_v10 = vpop.permute.xlu0 %30 }
  0x83   :  { %v38_v11 = vmul.f32 %v31_v10, %v18_v5  ;;  %v39_v12 = vmul.f32 %v31_v10, %v19_v6  ;;  %v40_v13 = vmul.f32 %v31_v10, %v20_v7  ;;  %v41_v14 = vmul.f32 %v31_v10, %v21_v8 }
  0x85   :  { %v59_v20 = vadd.f32 %v51_v9, %v39_v12  ;;  %v61_v21 = vadd.f32 %v51_v9, %v41_v14  ;;  %v58_v22 = vadd.f32 %v51_v9, %v38_v11  ;;  %v60_v23 = vadd.f32 %v51_v9, %v40_v13  ;;  %v56_v28 = vpop.permute.xlu1 %55 }
  0x86   :  { %v36_v19 = vpop.permute.xlu0 %35 }
  0x87   :  { %v42_v24 = vmul.f32 %v36_v19, %v22_v15  ;;  %v43_v25 = vmul.f32 %v36_v19, %v23_v16  ;;  %v44_v26 = vmul.f32 %v36_v19, %v24_v17  ;;  %v45_v27 = vmul.f32 %v36_v19, %v25_v18 }
  0x88   :  { %v67_v33 = vmax.f32 %v59_v20, 0.0  ;;  %v69_v34 = vmax.f32 %v61_v21, 0.0  ;;  %v66_v35 = vmax.f32 %v58_v22, 0.0  ;;  %v68_v36 = vmax.f32 %v60_v23, 0.0 }
  0x89   :  { %v63_v29 = vadd.f32 %v56_v28, %v43_v25  ;;  %v65_v30 = vadd.f32 %v56_v28, %v45_v27  ;;  %v62_v31 = vadd.f32 %v56_v28, %v42_v24  ;;  %v64_v32 = vadd.f32 %v56_v28, %v44_v26 }
  0x8b   :  { %v71_v37 = vmax.f32 %v63_v29, 0.0  ;;  %v73_v38 = vmax.f32 %v65_v30, 0.0  ;;  %v70_v39 = vmax.f32 %v62_v31, 0.0  ;;  %v72_v40 = vmax.f32 %v64_v32, 0.0 }
  0x8d   :  { %v78_v43 = vpack.c.bf16 %v71_v37, %v67_v33  ;;  %v80_v44 = vpack.c.bf16 %v73_v38, %v69_v34  ;;  %v77_v45 = vpack.c.bf16 %v70_v39, %v66_v35  ;;  %v79_v46 = vpack.c.bf16 %v72_v40, %v68_v36 }
  0x8f   :  { %196 = vmatprep.subr.msk.bf16.mxu0 %vm85_vm0, %v78_v43  ;;  %198 = vmatprep.subr.msk.bf16.mxu1 %vm85_vm0, %v80_v44  ;;  %v87_v47 = vsel %vm85_vm0, %v77_v45, 0  ;;  %v93_v48 = vsel %vm85_vm0, %v79_v46, 0 }
  0x90   :  { %99 = vmatpush1.bf16.msra.mxu0 %v87_v47  ;;  %142 = vmatpush1.bf16.msra.mxu1 %v93_v48 }
  0x93   :  { %197 = vmatmul.mubr.msk.bf16.vlgmr.msra.gmra.mrb[0].mxu0 %vm81_vm1, %v76_v49  ;;  %199 = vmatmul.mubr.msk.bf16.vlgmr.msra.gmra.mrb[0].mxu1 %vm81_vm1, %v76_v49 }
 0x166   :  { %v132_v50 = vpop.f32.mrb[0].mxu0  ;;  %v175_v51 = vpop.f32.mrb[0].mxu1 }
 0x167   :  { %184 = vst [vmem:[%s299_s4] sm:$0xff] %v132_v50  ;;  %186 = vst [vmem:[%s299_s4 + $0x10] sm:$0xff] %v175_v51  ;;  %v134_v52 = vpop.f32.mrb[1].mxu0  ;;  %v177_v53 = vpop.f32.mrb[1].mxu1 }
 0x168   :  { %185 = vst [vmem:[%s299_s4 + $0x8] sm:$0xff] %v134_v52  ;;  %187 = vst [vmem:[%s299_s4 + $0x18] sm:$0xff] %v177_v53  ;;  %v136_v54 = vpop.f32.mrb[2].mxu0  ;;  %v179_v55 = vpop.f32.mrb[2].mxu1 }
 0x169   :  { %188 = vst [vmem:[%s299_s4 + $0x20] sm:$0xff] %v136_v54  ;;  %190 = vst [vmem:[%s299_s4 + $0x30] sm:$0xff] %v179_v55  ;;  %v138_v56 = vpop.f32.mrb[3].mxu0  ;;  %v181_v57 = vpop.f32.mrb[3].mxu1 }
 0x16a   :  { %189 = vst [vmem:[%s299_s4 + $0x28] sm:$0xff] %v138_v56  ;;  %191 = vst [vmem:[%s299_s4 + $0x38] sm:$0xff] %v181_v57 }

</bundles_post_ra>
